<compile_context>
chip_gen: v7x
topology: tpu7x:2x2x1
jax: 0.10.0
libtpu: 0.0.40
codegen_flags: <defaults>
</compile_context>

<pallas_src>
import functools
import math
from dataclasses import dataclass

import jax
import jax.numpy as jnp
from jax.experimental import pallas as pl
from jax.experimental.pallas import tpu as pltpu

EPS = 1e-6


@dataclass(frozen=True)
class Config:
    vocab_size: int = 256
    d_model: int = 32
    num_layers: int = 2
    num_heads: int = 2
    seq_len: int = 8
    hidden_dim: int = 64
    dropout: float = 0.0          # eval-mode / p=0 -> identity
    bias: bool = False
    activation: str = "silu"
    mlp: str = "GLU"
    attn_type: str = "mla"
    weight_tying: bool = False
    rope_head_dim: int = 8
    nope_head_dim: int = 8
    v_head_dim: int = 16
    q_lora_rank: int = 16
    kv_lora_rank: int = 16


# ----------------------------------------------------------------------------- fused Pallas kernel

def _transformer_kernel(x_ref, qcos_ref, qsin_ref, kcos_ref, ksin_ref,
                        n1_ref, win_ref, qn_ref, wdq_ref,
                        kvn_ref, wdkv_ref, wpr_ref,
                        n2_ref, w13_ref, w2_ref, nf_ref, wv_ref,
                        o_ref, *, num_layers, num_heads, nope_dim, rope_dim,
                        v_dim, hidden_dim, seq_len, q_lora, kv_lora):
    """One grid step = one batch element's full forward pass (all layers)."""
    S = seq_len
    nh = num_heads
    QN = nh * nope_dim            # total nope width across heads
    QR = nh * rope_dim            # total rope width across heads
    QL, KL, RD = q_lora, kv_lora, rope_dim

    x = x_ref[0]                                   # (S, D)
    qcos = qcos_ref[...]                           # (S, nh*rope)  cos, pair-duplicated, tiled per head
    qsin = qsin_ref[...]                           # (S, nh*rope)  sin with (-,+) pair signs
    kcos = kcos_ref[...]                           # (S, rope)
    ksin = ksin_ref[...]                           # (S, rope)

    # Additive causal bias, built once for the whole forward pass.
    row = jax.lax.broadcasted_iota(jnp.int32, (S, S), 0)
    col = jax.lax.broadcasted_iota(jnp.int32, (S, S), 1)
    bias = jnp.where(col <= row, jnp.float32(0.0), jnp.float32(-1e30))

    def rms(v, w):
        ms = jnp.mean(v * v, axis=-1, keepdims=True)
        return w * v * jax.lax.rsqrt(ms + EPS)

    def dot(a, b):
        return jnp.dot(a, b, preferred_element_type=jnp.float32)

    def qkT(a, b):   # a @ b.T without an explicit transpose
        return jax.lax.dot_general(a, b, (((1,), (1,)), ((), ())),
                                   preferred_element_type=jnp.float32)

    for l in range(num_layers):                    # static unroll (num_layers=2)
        # -------------------- MLA attention branch --------------------
        h = rms(x, n1_ref[l])                                      # norm1(x)

        # Fused from-residual projection: [compress_q | compress_kv | k_rope | k_rope-swapped].
        # The MLA 1/num_heads factor on k_rope is pre-baked into the weights.
        z = dot(h, win_ref[l])                                     # (S, QL+KL+2*RD)
        cq = rms(z[:, :QL], qn_ref[l])                             # + q_norm
        ckv = rms(z[:, QL:QL + KL], kvn_ref[l])                    # + kv_norm
        k_rope = z[:, QL + KL:QL + KL + RD]
        k_rope_sw = z[:, QL + KL + RD:]

        # Decompress q: [nope | rope | rope-swapped]; 1/sqrt(head_dim) score
        # scale is pre-baked into these weights.
        q_all = dot(cq, wdq_ref[l])                                # (S, QN + 2*QR)
        q_nope = q_all[:, :QN]
        q_rope = q_all[:, QN:QN + QR]
        q_rope_sw = q_all[:, QN + QR:]

        # Decompress kv: [k_nope | v].
        kv_all = dot(ckv, wdkv_ref[l])                             # (S, QN + nh*v_dim)
        k_nope = kv_all[:, :QN]
        v_all = kv_all[:, QN:]

        # RoPE: interleaved (even, odd) pair rotation; the pair swap is
        # pre-baked into a column-permuted copy of the weights -> pure VPU math.
        q_rope = q_rope * qcos + q_rope_sw * qsin
        k_rope = k_rope * kcos + k_rope_sw * ksin                  # shared rope key (all heads)

        outs = []
        for hd in range(nh):                                        # static unroll over heads
            qn_h = q_nope[:, hd * nope_dim:(hd + 1) * nope_dim]     # (S, nope)
            qr_h = q_rope[:, hd * rope_dim:(hd + 1) * rope_dim]     # (S, rope)
            kn_h = k_nope[:, hd * nope_dim:(hd + 1) * nope_dim]     # (S, nope)
            v_h = v_all[:, hd * v_dim:(hd + 1) * v_dim]             # (S, v_dim)

            # q.k = q_nope.k_nope + q_rope.k_rope (== concat-then-dot), scale pre-baked.
            s = qkT(qn_h, kn_h) + qkT(qr_h, k_rope) + bias          # causal additive mask
            m = jnp.max(s, axis=-1, keepdims=True)
            e = jnp.exp(s - m)
            p = e * pl.reciprocal(jnp.sum(e, axis=-1, keepdims=True), approx=True)
            outs.append(dot(p, v_h))                                # (S, v_dim)

        # Concat heads then ONE output-projection matmul per layer.
        attn = dot(jnp.concatenate(outs, axis=-1), wpr_ref[l])      # (S, D)
        x = x + attn
        # TODO(synk): attention / residual dropout are identity (p=0.0, eval mode).

        # -------------------- GLU feed-forward branch --------------------
        h2 = rms(x, n2_ref[l])                                      # norm2(x)
        h13 = dot(h2, w13_ref[l])                                   # (S, 2H), lane-dense (128)
        g = jax.nn.silu(h13[:, :hidden_dim]) * h13[:, hidden_dim:]
        x = x + dot(g, w2_ref[l])

    # -------------------- final norm + vocab projection --------------------
    xf = rms(x, nf_ref[...])
    o_ref[0] = dot(xf, wv_ref[...])                                 # (S, vocab), lane-dense (256)


# ----------------------------------------------------------------------------- forward wrapper

def transformer_forward(fp, tokens, cfg: Config):
    B, S = tokens.shape
    # TODO(synk): token-embedding gather stays in JAX (data-dependent HBM gather).
    x = jnp.take(fp["token_emb"], tokens, axis=0)                   # (B, S, D)

    consts = [fp["q_cos"][:S], fp["q_sin"][:S], fp["k_cos"][:S], fp["k_sin"][:S],
              fp["norm1"], fp["w_in"], fp["q_norm"], fp["w_dq"],
              fp["kv_norm"], fp["w_dkv"], fp["w_proj"],
              fp["norm2"], fp["w13"], fp["w2"], fp["fnorm"], fp["w_vocab"]]

    kernel = functools.partial(
        _transformer_kernel,
        num_layers=cfg.num_layers, num_heads=cfg.num_heads,
        nope_dim=cfg.nope_head_dim, rope_dim=cfg.rope_head_dim,
        v_dim=cfg.v_head_dim, hidden_dim=cfg.hidden_dim, seq_len=S,
        q_lora=cfg.q_lora_rank, kv_lora=cfg.kv_lora_rank)

    def const_spec(a):
        nd = a.ndim
        return pl.BlockSpec(a.shape, lambda b, _n=nd: (0,) * _n)    # grid-invariant, fetched once

    logits = pl.pallas_call(
        kernel,
        out_shape=jax.ShapeDtypeStruct((B, S, cfg.vocab_size), jnp.float32),
        grid=(B,),
        in_specs=[pl.BlockSpec((1, S, cfg.d_model), lambda b: (b, 0, 0))]
                 + [const_spec(a) for a in consts],
        out_specs=pl.BlockSpec((1, S, cfg.vocab_size), lambda b: (b, 0, 0)),
        compiler_params=pltpu.CompilerParams(dimension_semantics=("parallel",)),
    )(x, *consts)
    return logits


# ----------------------------------------------------------------------------- deterministic init

def init_params(cfg: Config, key):
    """Per-module weights mirroring the PyTorch ModelingLM structure."""
    std = cfg.d_model ** (-0.5)
    keys = iter(jax.random.split(key, 256))

    def lin(din, dout, s=std):   # torch Linear weight, stored transposed as (in, out)
        return jax.random.truncated_normal(next(keys), -3.0, 3.0, (din, dout), jnp.float32) * s

    nh = cfg.num_heads
    params = {
        "token_emb": jax.random.truncated_normal(
            next(keys), -3.0, 3.0, (cfg.vocab_size, cfg.d_model), jnp.float32) * 0.02,
        "layers": [],
        "norm": jnp.ones((cfg.d_model,), jnp.float32),
        "vocab_proj": lin(cfg.d_model, cfg.vocab_size),
    }
    for _ in range(cfg.num_layers):
        attn = dict(
            compress_q=lin(cfg.d_model, cfg.q_lora_rank),
            decompress_q_nope=lin(cfg.q_lora_rank, nh * cfg.nope_head_dim),
            decompress_q_rope=lin(cfg.q_lora_rank, nh * cfg.rope_head_dim),
            q_norm=jnp.ones((cfg.q_lora_rank,), jnp.float32),
            compress_kv=lin(cfg.d_model, cfg.kv_lora_rank),
            decompress_k_nope=lin(cfg.kv_lora_rank, nh * cfg.nope_head_dim),
            decompress_v=lin(cfg.kv_lora_rank, nh * cfg.v_head_dim),
            kv_norm=jnp.ones((cfg.kv_lora_rank,), jnp.float32),
            k_rope=lin(cfg.d_model, cfg.rope_head_dim),
            proj=lin(nh * cfg.v_head_dim, cfg.d_model),
        )
        ff = dict(
            w1=lin(cfg.d_model, cfg.hidden_dim),
            w3=lin(cfg.d_model, cfg.hidden_dim),
            w2=lin(cfg.hidden_dim, cfg.d_model),
        )
        params["layers"].append(dict(
            attn=attn, ff=ff,
            norm1=jnp.ones((cfg.d_model,), jnp.float32),
            norm2=jnp.ones((cfg.d_model,), jnp.float32),
        ))
    cos, sin = precompute_freqs_cis(cfg.rope_head_dim, cfg.seq_len * 2)
    params["freq_cos"] = cos
    params["freq_sin"] = sin
    return params


def precompute_freqs_cis(dim, end, theta=10000.0):
    freqs = 1.0 / (theta ** (jnp.arange(0, dim, 2)[: dim // 2].astype(jnp.float32) / dim))
    t = jnp.arange(end, dtype=jnp.float32)
    freqs = jnp.outer(t, freqs)          # (end, dim//2)
    return jnp.cos(freqs), jnp.sin(freqs)


def fuse_params(params, cfg: Config):
    """Stack per-layer weights and build lane-dense fused slabs + RoPE tables.

    Folds the attention score scale into the q-decompress weights and the MLA
    1/num_heads factor into the k_rope columns of the fused input slab.
    """
    layers = params["layers"]
    nh = cfg.num_heads
    scale = 1.0 / math.sqrt(cfg.nope_head_dim + cfg.rope_head_dim)
    inv_nh = 1.0 / nh

    def swap_cols(w):   # swap adjacent output columns: [0,1,2,3,...] -> [1,0,3,2,...]
        n = w.shape[1]
        perm = jnp.arange(n).reshape(-1, 2)[:, ::-1].reshape(-1)
        return w[:, perm]

    fused = {
        "token_emb": params["token_emb"],
        "norm1": jnp.stack([l["norm1"].reshape(1, -1) for l in layers]),
        # fused from-residual slab: [compress_q | compress_kv | k_rope/nh | swap(k_rope)/nh]
        "w_in": jnp.stack([jnp.concatenate(
            [l["attn"]["compress_q"],
             l["attn"]["compress_kv"],
             l["attn"]["k_rope"] * inv_nh,
             swap_cols(l["attn"]["k_rope"]) * inv_nh], axis=1) for l in layers]),
        "q_norm": jnp.stack([l["attn"]["q_norm"].reshape(1, -1) for l in layers]),
        # fused q-decompress slab (score scale baked in): [nope | rope | rope-swapped]
        "w_dq": jnp.stack([jnp.concatenate(
            [l["attn"]["decompress_q_nope"],
             l["attn"]["decompress_q_rope"],
             swap_cols(l["attn"]["decompress_q_rope"])], axis=1) * scale for l in layers]),
        "kv_norm": jnp.stack([l["attn"]["kv_norm"].reshape(1, -1) for l in layers]),
        "w_dkv": jnp.stack([jnp.concatenate(
            [l["attn"]["decompress_k_nope"], l["attn"]["decompress_v"]], axis=1)
            for l in layers]),
        "w_proj": jnp.stack([l["attn"]["proj"] for l in layers]),
        "norm2": jnp.stack([l["norm2"].reshape(1, -1) for l in layers]),
        "w13": jnp.stack([jnp.concatenate([l["ff"]["w1"], l["ff"]["w3"]], axis=1)
                          for l in layers]),
        "w2": jnp.stack([l["ff"]["w2"] for l in layers]),
        "fnorm": params["norm"].reshape(1, -1),
        "w_vocab": params["vocab_proj"],
    }

    # RoPE tables in interleaved (even, odd)-pair form:
    #   out[2i]   = x[2i]*cos[i] - x[2i+1]*sin[i]
    #   out[2i+1] = x[2i]*sin[i] + x[2i+1]*cos[i]
    # implemented as  out = x*cos_rep + x_swapped*sin_signed  (swap baked into weights).
    cos, sin = params["freq_cos"], params["freq_sin"]                 # (2*seq_len, rope//2)
    cos2 = jnp.repeat(cos, 2, axis=-1)                                # (2*seq_len, rope)
    sin2 = jnp.repeat(sin, 2, axis=-1)
    sign = jnp.tile(jnp.array([-1.0, 1.0], jnp.float32), cfg.rope_head_dim // 2)
    sin2 = sin2 * sign[None, :]
    fused["k_cos"] = cos2
    fused["k_sin"] = sin2
    fused["q_cos"] = jnp.tile(cos2, (1, nh))
    fused["q_sin"] = jnp.tile(sin2, (1, nh))
    return fused


# ----------------------------------------------------------------------------- main

if __name__ == "__main__":
    cfg = Config()
    root_key = jax.random.PRNGKey(0)
    pkey, tkey = jax.random.split(root_key)

    params = init_params(cfg, pkey)
    fused = fuse_params(params, cfg)
    tokens = jax.random.randint(tkey, (2, cfg.seq_len), 0, cfg.vocab_size, dtype=jnp.int32)

    fwd = jax.jit(lambda p, t: transformer_forward(p, t, cfg))
    logits = fwd(fused, tokens)
    logits = jax.block_until_ready(logits)

    assert logits.shape == (2, cfg.seq_len, cfg.vocab_size), logits.shape
    assert bool(jnp.all(jnp.isfinite(logits)))
    print("KERNEL_OK")
</pallas_src>

<mosaic_0001>
module attributes {stable_mosaic.version = 11 : i64} {
  func.func @_transformer_kernel(%arg0: i32, %arg1: memref<1x8x32xf32, #tpu.memory_space<vmem>>, %arg2: memref<8x16xf32, #tpu.memory_space<vmem>>, %arg3: memref<8x16xf32, #tpu.memory_space<vmem>>, %arg4: memref<8x8xf32, #tpu.memory_space<vmem>>, %arg5: memref<8x8xf32, #tpu.memory_space<vmem>>, %arg6: memref<2x1x32xf32, #tpu.memory_space<vmem>>, %arg7: memref<2x32x48xf32, #tpu.memory_space<vmem>>, %arg8: memref<2x1x16xf32, #tpu.memory_space<vmem>>, %arg9: memref<2x16x48xf32, #tpu.memory_space<vmem>>, %arg10: memref<2x1x16xf32, #tpu.memory_space<vmem>>, %arg11: memref<2x16x48xf32, #tpu.memory_space<vmem>>, %arg12: memref<2x32x32xf32, #tpu.memory_space<vmem>>, %arg13: memref<2x1x32xf32, #tpu.memory_space<vmem>>, %arg14: memref<2x32x128xf32, #tpu.memory_space<vmem>>, %arg15: memref<2x64x32xf32, #tpu.memory_space<vmem>>, %arg16: memref<1x32xf32, #tpu.memory_space<vmem>>, %arg17: memref<32x256xf32, #tpu.memory_space<vmem>>, %arg18: memref<1x8x256xf32, #tpu.memory_space<vmem>>) attributes {dimension_semantics = [#tpu.dimension_semantics<parallel>], iteration_bounds = array<i64: 2>, scalar_prefetch = 0 : i64, scratch_operands = 0 : i64, tpu.core_type = #tpu.core_type<tc>, window_params = [{transform_indices = @transform_0, window_bounds = array<i64: 1, 8, 32>}, {pipeline_mode = #tpu.pipeline_mode<synchronous>, transform_indices = @transform_1, window_bounds = array<i64: 8, 16>}, {pipeline_mode = #tpu.pipeline_mode<synchronous>, transform_indices = @transform_2, window_bounds = array<i64: 8, 16>}, {pipeline_mode = #tpu.pipeline_mode<synchronous>, transform_indices = @transform_3, window_bounds = array<i64: 8, 8>}, {pipeline_mode = #tpu.pipeline_mode<synchronous>, transform_indices = @transform_4, window_bounds = array<i64: 8, 8>}, {pipeline_mode = #tpu.pipeline_mode<synchronous>, transform_indices = @transform_5, window_bounds = array<i64: 2, 1, 32>}, {pipeline_mode = #tpu.pipeline_mode<synchronous>, transform_indices = @transform_6, window_bounds = array<i64: 2, 32, 48>}, {pipeline_mode = #tpu.pipeline_mode<synchronous>, transform_indices = @transform_7, window_bounds = array<i64: 2, 1, 16>}, {pipeline_mode = #tpu.pipeline_mode<synchronous>, transform_indices = @transform_8, window_bounds = array<i64: 2, 16, 48>}, {pipeline_mode = #tpu.pipeline_mode<synchronous>, transform_indices = @transform_9, window_bounds = array<i64: 2, 1, 16>}, {pipeline_mode = #tpu.pipeline_mode<synchronous>, transform_indices = @transform_10, window_bounds = array<i64: 2, 16, 48>}, {pipeline_mode = #tpu.pipeline_mode<synchronous>, transform_indices = @transform_11, window_bounds = array<i64: 2, 32, 32>}, {pipeline_mode = #tpu.pipeline_mode<synchronous>, transform_indices = @transform_12, window_bounds = array<i64: 2, 1, 32>}, {pipeline_mode = #tpu.pipeline_mode<synchronous>, transform_indices = @transform_13, window_bounds = array<i64: 2, 32, 128>}, {pipeline_mode = #tpu.pipeline_mode<synchronous>, transform_indices = @transform_14, window_bounds = array<i64: 2, 64, 32>}, {pipeline_mode = #tpu.pipeline_mode<synchronous>, transform_indices = @transform_15, window_bounds = array<i64: 1, 32>}, {pipeline_mode = #tpu.pipeline_mode<synchronous>, transform_indices = @transform_16, window_bounds = array<i64: 32, 256>}, {transform_indices = @transform_17, window_bounds = array<i64: 1, 8, 256>}]} {
    %c0 = arith.constant 0 : index
    %c0_0 = arith.constant 0 : index
    %c0_1 = arith.constant 0 : index
    %0 = vector.load %arg1[%c0, %c0_0, %c0_1] : memref<1x8x32xf32, #tpu.memory_space<vmem>>, vector<1x8x32xf32>
    %1 = vector.shape_cast %0 : vector<1x8x32xf32> to vector<8x32xf32>
    %c0_2 = arith.constant 0 : index
    %c0_3 = arith.constant 0 : index
    %2 = vector.load %arg2[%c0_2, %c0_3] : memref<8x16xf32, #tpu.memory_space<vmem>>, vector<8x16xf32>
    %c0_4 = arith.constant 0 : index
    %c0_5 = arith.constant 0 : index
    %3 = vector.load %arg3[%c0_4, %c0_5] : memref<8x16xf32, #tpu.memory_space<vmem>>, vector<8x16xf32>
    %c0_6 = arith.constant 0 : index
    %c0_7 = arith.constant 0 : index
    %4 = vector.load %arg4[%c0_6, %c0_7] : memref<8x8xf32, #tpu.memory_space<vmem>>, vector<8x8xf32>
    %c0_8 = arith.constant 0 : index
    %c0_9 = arith.constant 0 : index
    %5 = vector.load %arg5[%c0_8, %c0_9] : memref<8x8xf32, #tpu.memory_space<vmem>>, vector<8x8xf32>
    %6 = tpu.iota {dimensions = array<i32: 0>} : vector<8x8xi32>
    %7 = tpu.iota {dimensions = array<i32: 1>} : vector<8x8xi32>
    %8 = arith.cmpi sle, %7, %6 : vector<8x8xi32>
    %cst = arith.constant 0.000000e+00 : f32
    %cst_10 = arith.constant -1.000000e+30 : f32
    %9 = vector.broadcast %cst : f32 to vector<8x8xf32>
    %10 = vector.broadcast %cst_10 : f32 to vector<8x8xf32>
    %11 = arith.select %8, %9, %10 : vector<8x8xi1>, vector<8x8xf32>
    %c0_11 = arith.constant 0 : index
    %c0_12 = arith.constant 0 : index
    %c0_13 = arith.constant 0 : index
    %12 = vector.load %arg6[%c0_11, %c0_12, %c0_13] : memref<2x1x32xf32, #tpu.memory_space<vmem>>, vector<1x1x32xf32>
    %13 = vector.shape_cast %12 : vector<1x1x32xf32> to vector<1x32xf32>
    %14 = arith.mulf %1, %1 : vector<8x32xf32>
    %cst_14 = arith.constant dense<0.000000e+00> : vector<8xf32>
    %15 = vector.multi_reduction <add>, %14, %cst_14 [1] : vector<8x32xf32> to vector<8xf32>
    %16 = vector.shape_cast %15 : vector<8xf32> to vector<8x1xf32>
    %cst_15 = arith.constant 3.200000e+01 : f32
    %17 = vector.broadcast %cst_15 : f32 to vector<8x1xf32>
    %18 = arith.divf %16, %17 : vector<8x1xf32>
    %19 = vector.broadcast %13 : vector<1x32xf32> to vector<8x32xf32>
    %20 = arith.mulf %19, %1 : vector<8x32xf32>
    %cst_16 = arith.constant 9.99999997E-7 : f32
    %21 = vector.broadcast %cst_16 : f32 to vector<8x1xf32>
    %22 = arith.addf %18, %21 : vector<8x1xf32>
    %23 = math.rsqrt %22 : vector<8x1xf32>
    %24 = vector.broadcast %23 : vector<8x1xf32> to vector<8x32xf32>
    %25 = arith.mulf %20, %24 : vector<8x32xf32>
    %c0_17 = arith.constant 0 : index
    %c0_18 = arith.constant 0 : index
    %c0_19 = arith.constant 0 : index
    %26 = vector.load %arg7[%c0_17, %c0_18, %c0_19] : memref<2x32x48xf32, #tpu.memory_space<vmem>>, vector<1x32x48xf32>
    %27 = vector.shape_cast %26 : vector<1x32x48xf32> to vector<32x48xf32>
    %cst_20 = arith.constant dense<0.000000e+00> : vector<8x48xf32>
    %28 = tpu.matmul %25, %27, %cst_20 {dimension_numbers = #tpu.dot_dimension_numbers<[1], [0], [0], [1], [0, 0, 1, 1], [], []>} : vector<8x32xf32>, vector<32x48xf32>, vector<8x48xf32> -> vector<8x48xf32>
    %29 = vector.extract_strided_slice %28 {offsets = [0, 0], sizes = [8, 16], strides = [1, 1]} : vector<8x48xf32> to vector<8x16xf32>
    %c0_21 = arith.constant 0 : index
    %c0_22 = arith.constant 0 : index
    %c0_23 = arith.constant 0 : index
    %30 = vector.load %arg8[%c0_21, %c0_22, %c0_23] : memref<2x1x16xf32, #tpu.memory_space<vmem>>, vector<1x1x16xf32>
    %31 = vector.shape_cast %30 : vector<1x1x16xf32> to vector<1x16xf32>
    %32 = arith.mulf %29, %29 : vector<8x16xf32>
    %cst_24 = arith.constant dense<0.000000e+00> : vector<8xf32>
    %33 = vector.multi_reduction <add>, %32, %cst_24 [1] : vector<8x16xf32> to vector<8xf32>
    %34 = vector.shape_cast %33 : vector<8xf32> to vector<8x1xf32>
    %cst_25 = arith.constant 1.600000e+01 : f32
    %35 = vector.broadcast %cst_25 : f32 to vector<8x1xf32>
    %36 = arith.divf %34, %35 : vector<8x1xf32>
    %37 = vector.broadcast %31 : vector<1x16xf32> to vector<8x16xf32>
    %38 = arith.mulf %37, %29 : vector<8x16xf32>
    %cst_26 = arith.constant 9.99999997E-7 : f32
    %39 = vector.broadcast %cst_26 : f32 to vector<8x1xf32>
    %40 = arith.addf %36, %39 : vector<8x1xf32>
    %41 = math.rsqrt %40 : vector<8x1xf32>
    %42 = vector.broadcast %41 : vector<8x1xf32> to vector<8x16xf32>
    %43 = arith.mulf %38, %42 : vector<8x16xf32>
    %44 = vector.extract_strided_slice %28 {offsets = [0, 16], sizes = [8, 16], strides = [1, 1]} : vector<8x48xf32> to vector<8x16xf32>
    %c0_27 = arith.constant 0 : index
    %c0_28 = arith.constant 0 : index
    %c0_29 = arith.constant 0 : index
    %45 = vector.load %arg10[%c0_27, %c0_28, %c0_29] : memref<2x1x16xf32, #tpu.memory_space<vmem>>, vector<1x1x16xf32>
    %46 = vector.shape_cast %45 : vector<1x1x16xf32> to vector<1x16xf32>
    %47 = arith.mulf %44, %44 : vector<8x16xf32>
    %cst_30 = arith.constant dense<0.000000e+00> : vector<8xf32>
    %48 = vector.multi_reduction <add>, %47, %cst_30 [1] : vector<8x16xf32> to vector<8xf32>
    %49 = vector.shape_cast %48 : vector<8xf32> to vector<8x1xf32>
    %cst_31 = arith.constant 1.600000e+01 : f32
    %50 = vector.broadcast %cst_31 : f32 to vector<8x1xf32>
    %51 = arith.divf %49, %50 : vector<8x1xf32>
    %52 = vector.broadcast %46 : vector<1x16xf32> to vector<8x16xf32>
    %53 = arith.mulf %52, %44 : vector<8x16xf32>
    %cst_32 = arith.constant 9.99999997E-7 : f32
    %54 = vector.broadcast %cst_32 : f32 to vector<8x1xf32>
    %55 = arith.addf %51, %54 : vector<8x1xf32>
    %56 = math.rsqrt %55 : vector<8x1xf32>
    %57 = vector.broadcast %56 : vector<8x1xf32> to vector<8x16xf32>
    %58 = arith.mulf %53, %57 : vector<8x16xf32>
    %59 = vector.extract_strided_slice %28 {offsets = [0, 32], sizes = [8, 8], strides = [1, 1]} : vector<8x48xf32> to vector<8x8xf32>
    %60 = vector.extract_strided_slice %28 {offsets = [0, 40], sizes = [8, 8], strides = [1, 1]} : vector<8x48xf32> to vector<8x8xf32>
    %c0_33 = arith.constant 0 : index
    %c0_34 = arith.constant 0 : index
    %c0_35 = arith.constant 0 : index
    %61 = vector.load %arg9[%c0_33, %c0_34, %c0_35] : memref<2x16x48xf32, #tpu.memory_space<vmem>>, vector<1x16x48xf32>
    %62 = vector.shape_cast %61 : vector<1x16x48xf32> to vector<16x48xf32>
    %cst_36 = arith.constant dense<0.000000e+00> : vector<8x48xf32>
    %63 = tpu.matmul %43, %62, %cst_36 {dimension_numbers = #tpu.dot_dimension_numbers<[1], [0], [0], [1], [0, 0, 1, 1], [], []>} : vector<8x16xf32>, vector<16x48xf32>, vector<8x48xf32> -> vector<8x48xf32>
    %64 = vector.extract_strided_slice %63 {offsets = [0, 0], sizes = [8, 16], strides = [1, 1]} : vector<8x48xf32> to vector<8x16xf32>
    %65 = vector.extract_strided_slice %63 {offsets = [0, 16], sizes = [8, 16], strides = [1, 1]} : vector<8x48xf32> to vector<8x16xf32>
    %66 = vector.extract_strided_slice %63 {offsets = [0, 32], sizes = [8, 16], strides = [1, 1]} : vector<8x48xf32> to vector<8x16xf32>
    %c0_37 = arith.constant 0 : index
    %c0_38 = arith.constant 0 : index
    %c0_39 = arith.constant 0 : index
    %67 = vector.load %arg11[%c0_37, %c0_38, %c0_39] : memref<2x16x48xf32, #tpu.memory_space<vmem>>, vector<1x16x48xf32>
    %68 = vector.shape_cast %67 : vector<1x16x48xf32> to vector<16x48xf32>
    %cst_40 = arith.constant dense<0.000000e+00> : vector<8x48xf32>
    %69 = tpu.matmul %58, %68, %cst_40 {dimension_numbers = #tpu.dot_dimension_numbers<[1], [0], [0], [1], [0, 0, 1, 1], [], []>} : vector<8x16xf32>, vector<16x48xf32>, vector<8x48xf32> -> vector<8x48xf32>
    %70 = vector.extract_strided_slice %69 {offsets = [0, 0], sizes = [8, 16], strides = [1, 1]} : vector<8x48xf32> to vector<8x16xf32>
    %71 = vector.extract_strided_slice %69 {offsets = [0, 16], sizes = [8, 32], strides = [1, 1]} : vector<8x48xf32> to vector<8x32xf32>
    %72 = arith.mulf %65, %2 : vector<8x16xf32>
    %73 = arith.mulf %66, %3 : vector<8x16xf32>
    %74 = arith.addf %72, %73 : vector<8x16xf32>
    %75 = arith.mulf %59, %4 : vector<8x8xf32>
    %76 = arith.mulf %60, %5 : vector<8x8xf32>
    %77 = arith.addf %75, %76 : vector<8x8xf32>
    %78 = vector.extract_strided_slice %64 {offsets = [0, 0], sizes = [8, 8], strides = [1, 1]} : vector<8x16xf32> to vector<8x8xf32>
    %79 = vector.extract_strided_slice %74 {offsets = [0, 0], sizes = [8, 8], strides = [1, 1]} : vector<8x16xf32> to vector<8x8xf32>
    %80 = vector.extract_strided_slice %70 {offsets = [0, 0], sizes = [8, 8], strides = [1, 1]} : vector<8x16xf32> to vector<8x8xf32>
    %81 = vector.extract_strided_slice %71 {offsets = [0, 0], sizes = [8, 16], strides = [1, 1]} : vector<8x32xf32> to vector<8x16xf32>
    %cst_41 = arith.constant dense<0.000000e+00> : vector<8x8xf32>
    %82 = tpu.matmul %78, %80, %cst_41 {dimension_numbers = #tpu.dot_dimension_numbers<[1], [1], [0], [0], [0, 0, 1, 0], [], []>} : vector<8x8xf32>, vector<8x8xf32>, vector<8x8xf32> -> vector<8x8xf32>
    %cst_42 = arith.constant dense<0.000000e+00> : vector<8x8xf32>
    %83 = tpu.matmul %79, %77, %cst_42 {dimension_numbers = #tpu.dot_dimension_numbers<[1], [1], [0], [0], [0, 0, 1, 0], [], []>} : vector<8x8xf32>, vector<8x8xf32>, vector<8x8xf32> -> vector<8x8xf32>
    %84 = arith.addf %82, %83 : vector<8x8xf32>
    %85 = arith.addf %84, %11 : vector<8x8xf32>
    %cst_43 = arith.constant dense<0xFF800000> : vector<8xf32>
    %86 = vector.multi_reduction <maximumf>, %85, %cst_43 [1] : vector<8x8xf32> to vector<8xf32>
    %87 = vector.shape_cast %86 : vector<8xf32> to vector<8x1xf32>
    %88 = vector.broadcast %87 : vector<8x1xf32> to vector<8x8xf32>
    %89 = arith.subf %85, %88 : vector<8x8xf32>
    %90 = math.exp %89 : vector<8x8xf32>
    %cst_44 = arith.constant dense<0.000000e+00> : vector<8xf32>
    %91 = vector.multi_reduction <add>, %90, %cst_44 [1] : vector<8x8xf32> to vector<8xf32>
    %92 = vector.shape_cast %91 : vector<8xf32> to vector<8x1xf32>
    %93 = tpu.reciprocal %92 {approx = true} : vector<8x1xf32> -> vector<8x1xf32>
    %94 = vector.broadcast %93 : vector<8x1xf32> to vector<8x8xf32>
    %95 = arith.mulf %90, %94 : vector<8x8xf32>
    %cst_45 = arith.constant dense<0.000000e+00> : vector<8x16xf32>
    %96 = tpu.matmul %95, %81, %cst_45 {dimension_numbers = #tpu.dot_dimension_numbers<[1], [0], [0], [1], [0, 0, 1, 1], [], []>} : vector<8x8xf32>, vector<8x16xf32>, vector<8x16xf32> -> vector<8x16xf32>
    %97 = vector.extract_strided_slice %64 {offsets = [0, 8], sizes = [8, 8], strides = [1, 1]} : vector<8x16xf32> to vector<8x8xf32>
    %98 = vector.extract_strided_slice %74 {offsets = [0, 8], sizes = [8, 8], strides = [1, 1]} : vector<8x16xf32> to vector<8x8xf32>
    %99 = vector.extract_strided_slice %70 {offsets = [0, 8], sizes = [8, 8], strides = [1, 1]} : vector<8x16xf32> to vector<8x8xf32>
    %100 = vector.extract_strided_slice %71 {offsets = [0, 16], sizes = [8, 16], strides = [1, 1]} : vector<8x32xf32> to vector<8x16xf32>
    %cst_46 = arith.constant dense<0.000000e+00> : vector<8x8xf32>
    %101 = tpu.matmul %97, %99, %cst_46 {dimension_numbers = #tpu.dot_dimension_numbers<[1], [1], [0], [0], [0, 0, 1, 0], [], []>} : vector<8x8xf32>, vector<8x8xf32>, vector<8x8xf32> -> vector<8x8xf32>
    %cst_47 = arith.constant dense<0.000000e+00> : vector<8x8xf32>
    %102 = tpu.matmul %98, %77, %cst_47 {dimension_numbers = #tpu.dot_dimension_numbers<[1], [1], [0], [0], [0, 0, 1, 0], [], []>} : vector<8x8xf32>, vector<8x8xf32>, vector<8x8xf32> -> vector<8x8xf32>
    %103 = arith.addf %101, %102 : vector<8x8xf32>
    %104 = arith.addf %103, %11 : vector<8x8xf32>
    %cst_48 = arith.constant dense<0xFF800000> : vector<8xf32>
    %105 = vector.multi_reduction <maximumf>, %104, %cst_48 [1] : vector<8x8xf32> to vector<8xf32>
    %106 = vector.shape_cast %105 : vector<8xf32> to vector<8x1xf32>
    %107 = vector.broadcast %106 : vector<8x1xf32> to vector<8x8xf32>
    %108 = arith.subf %104, %107 : vector<8x8xf32>
    %109 = math.exp %108 : vector<8x8xf32>
    %cst_49 = arith.constant dense<0.000000e+00> : vector<8xf32>
    %110 = vector.multi_reduction <add>, %109, %cst_49 [1] : vector<8x8xf32> to vector<8xf32>
    %111 = vector.shape_cast %110 : vector<8xf32> to vector<8x1xf32>
    %112 = tpu.reciprocal %111 {approx = true} : vector<8x1xf32> -> vector<8x1xf32>
    %113 = vector.broadcast %112 : vector<8x1xf32> to vector<8x8xf32>
    %114 = arith.mulf %109, %113 : vector<8x8xf32>
    %cst_50 = arith.constant dense<0.000000e+00> : vector<8x16xf32>
    %115 = tpu.matmul %114, %100, %cst_50 {dimension_numbers = #tpu.dot_dimension_numbers<[1], [0], [0], [1], [0, 0, 1, 1], [], []>} : vector<8x8xf32>, vector<8x16xf32>, vector<8x16xf32> -> vector<8x16xf32>
    %116 = tpu.concatenate %96, %115 in 1 : vector<8x16xf32>, vector<8x16xf32> -> vector<8x32xf32>
    %c0_51 = arith.constant 0 : index
    %c0_52 = arith.constant 0 : index
    %c0_53 = arith.constant 0 : index
    %117 = vector.load %arg12[%c0_51, %c0_52, %c0_53] : memref<2x32x32xf32, #tpu.memory_space<vmem>>, vector<1x32x32xf32>
    %118 = vector.shape_cast %117 : vector<1x32x32xf32> to vector<32x32xf32>
    %cst_54 = arith.constant dense<0.000000e+00> : vector<8x32xf32>
    %119 = tpu.matmul %116, %118, %cst_54 {dimension_numbers = #tpu.dot_dimension_numbers<[1], [0], [0], [1], [0, 0, 1, 1], [], []>} : vector<8x32xf32>, vector<32x32xf32>, vector<8x32xf32> -> vector<8x32xf32>
    %120 = arith.addf %1, %119 : vector<8x32xf32>
    %c0_55 = arith.constant 0 : index
    %c0_56 = arith.constant 0 : index
    %c0_57 = arith.constant 0 : index
    %121 = vector.load %arg13[%c0_55, %c0_56, %c0_57] : memref<2x1x32xf32, #tpu.memory_space<vmem>>, vector<1x1x32xf32>
    %122 = vector.shape_cast %121 : vector<1x1x32xf32> to vector<1x32xf32>
    %123 = arith.mulf %120, %120 : vector<8x32xf32>
    %cst_58 = arith.constant dense<0.000000e+00> : vector<8xf32>
    %124 = vector.multi_reduction <add>, %123, %cst_58 [1] : vector<8x32xf32> to vector<8xf32>
    %125 = vector.shape_cast %124 : vector<8xf32> to vector<8x1xf32>
    %cst_59 = arith.constant 3.200000e+01 : f32
    %126 = vector.broadcast %cst_59 : f32 to vector<8x1xf32>
    %127 = arith.divf %125, %126 : vector<8x1xf32>
    %128 = vector.broadcast %122 : vector<1x32xf32> to vector<8x32xf32>
    %129 = arith.mulf %128, %120 : vector<8x32xf32>
    %cst_60 = arith.constant 9.99999997E-7 : f32
    %130 = vector.broadcast %cst_60 : f32 to vector<8x1xf32>
    %131 = arith.addf %127, %130 : vector<8x1xf32>
    %132 = math.rsqrt %131 : vector<8x1xf32>
    %133 = vector.broadcast %132 : vector<8x1xf32> to vector<8x32xf32>
    %134 = arith.mulf %129, %133 : vector<8x32xf32>
    %c0_61 = arith.constant 0 : index
    %c0_62 = arith.constant 0 : index
    %c0_63 = arith.constant 0 : index
    %135 = vector.load %arg14[%c0_61, %c0_62, %c0_63] : memref<2x32x128xf32, #tpu.memory_space<vmem>>, vector<1x32x128xf32>
    %136 = vector.shape_cast %135 : vector<1x32x128xf32> to vector<32x128xf32>
    %cst_64 = arith.constant dense<0.000000e+00> : vector<8x128xf32>
    %137 = tpu.matmul %134, %136, %cst_64 {dimension_numbers = #tpu.dot_dimension_numbers<[1], [0], [0], [1], [0, 0, 1, 1], [], []>} : vector<8x32xf32>, vector<32x128xf32>, vector<8x128xf32> -> vector<8x128xf32>
    %138 = vector.extract_strided_slice %137 {offsets = [0, 0], sizes = [8, 64], strides = [1, 1]} : vector<8x128xf32> to vector<8x64xf32>
    %139 = arith.negf %138 : vector<8x64xf32>
    %140 = math.exp %139 : vector<8x64xf32>
    %cst_65 = arith.constant 1.000000e+00 : f32
    %141 = vector.broadcast %cst_65 : f32 to vector<8x64xf32>
    %142 = arith.addf %141, %140 : vector<8x64xf32>
    %143 = arith.divf %141, %142 : vector<8x64xf32>
    %144 = arith.mulf %138, %143 : vector<8x64xf32>
    %145 = vector.extract_strided_slice %137 {offsets = [0, 64], sizes = [8, 64], strides = [1, 1]} : vector<8x128xf32> to vector<8x64xf32>
    %146 = arith.mulf %144, %145 : vector<8x64xf32>
    %c0_66 = arith.constant 0 : index
    %c0_67 = arith.constant 0 : index
    %c0_68 = arith.constant 0 : index
    %147 = vector.load %arg15[%c0_66, %c0_67, %c0_68] : memref<2x64x32xf32, #tpu.memory_space<vmem>>, vector<1x64x32xf32>
    %148 = vector.shape_cast %147 : vector<1x64x32xf32> to vector<64x32xf32>
    %cst_69 = arith.constant dense<0.000000e+00> : vector<8x32xf32>
    %149 = tpu.matmul %146, %148, %cst_69 {dimension_numbers = #tpu.dot_dimension_numbers<[1], [0], [0], [1], [0, 0, 1, 1], [], []>} : vector<8x64xf32>, vector<64x32xf32>, vector<8x32xf32> -> vector<8x32xf32>
    %150 = arith.addf %120, %149 : vector<8x32xf32>
    %c1 = arith.constant 1 : index
    %c0_70 = arith.constant 0 : index
    %c0_71 = arith.constant 0 : index
    %151 = vector.load %arg6[%c1, %c0_70, %c0_71] : memref<2x1x32xf32, #tpu.memory_space<vmem>>, vector<1x1x32xf32>
    %152 = vector.shape_cast %151 : vector<1x1x32xf32> to vector<1x32xf32>
    %153 = arith.mulf %150, %150 : vector<8x32xf32>
    %cst_72 = arith.constant dense<0.000000e+00> : vector<8xf32>
    %154 = vector.multi_reduction <add>, %153, %cst_72 [1] : vector<8x32xf32> to vector<8xf32>
    %155 = vector.shape_cast %154 : vector<8xf32> to vector<8x1xf32>
    %cst_73 = arith.constant 3.200000e+01 : f32
    %156 = vector.broadcast %cst_73 : f32 to vector<8x1xf32>
    %157 = arith.divf %155, %156 : vector<8x1xf32>
    %158 = vector.broadcast %152 : vector<1x32xf32> to vector<8x32xf32>
    %159 = arith.mulf %158, %150 : vector<8x32xf32>
    %cst_74 = arith.constant 9.99999997E-7 : f32
    %160 = vector.broadcast %cst_74 : f32 to vector<8x1xf32>
    %161 = arith.addf %157, %160 : vector<8x1xf32>
    %162 = math.rsqrt %161 : vector<8x1xf32>
    %163 = vector.broadcast %162 : vector<8x1xf32> to vector<8x32xf32>
    %164 = arith.mulf %159, %163 : vector<8x32xf32>
    %c1_75 = arith.constant 1 : index
    %c0_76 = arith.constant 0 : index
    %c0_77 = arith.constant 0 : index
    %165 = vector.load %arg7[%c1_75, %c0_76, %c0_77] : memref<2x32x48xf32, #tpu.memory_space<vmem>>, vector<1x32x48xf32>
    %166 = vector.shape_cast %165 : vector<1x32x48xf32> to vector<32x48xf32>
    %cst_78 = arith.constant dense<0.000000e+00> : vector<8x48xf32>
    %167 = tpu.matmul %164, %166, %cst_78 {dimension_numbers = #tpu.dot_dimension_numbers<[1], [0], [0], [1], [0, 0, 1, 1], [], []>} : vector<8x32xf32>, vector<32x48xf32>, vector<8x48xf32> -> vector<8x48xf32>
    %168 = vector.extract_strided_slice %167 {offsets = [0, 0], sizes = [8, 16], strides = [1, 1]} : vector<8x48xf32> to vector<8x16xf32>
    %c1_79 = arith.constant 1 : index
    %c0_80 = arith.constant 0 : index
    %c0_81 = arith.constant 0 : index
    %169 = vector.load %arg8[%c1_79, %c0_80, %c0_81] : memref<2x1x16xf32, #tpu.memory_space<vmem>>, vector<1x1x16xf32>
    %170 = vector.shape_cast %169 : vector<1x1x16xf32> to vector<1x16xf32>
    %171 = arith.mulf %168, %168 : vector<8x16xf32>
    %cst_82 = arith.constant dense<0.000000e+00> : vector<8xf32>
    %172 = vector.multi_reduction <add>, %171, %cst_82 [1] : vector<8x16xf32> to vector<8xf32>
    %173 = vector.shape_cast %172 : vector<8xf32> to vector<8x1xf32>
    %cst_83 = arith.constant 1.600000e+01 : f32
    %174 = vector.broadcast %cst_83 : f32 to vector<8x1xf32>
    %175 = arith.divf %173, %174 : vector<8x1xf32>
    %176 = vector.broadcast %170 : vector<1x16xf32> to vector<8x16xf32>
    %177 = arith.mulf %176, %168 : vector<8x16xf32>
    %cst_84 = arith.constant 9.99999997E-7 : f32
    %178 = vector.broadcast %cst_84 : f32 to vector<8x1xf32>
    %179 = arith.addf %175, %178 : vector<8x1xf32>
    %180 = math.rsqrt %179 : vector<8x1xf32>
    %181 = vector.broadcast %180 : vector<8x1xf32> to vector<8x16xf32>
    %182 = arith.mulf %177, %181 : vector<8x16xf32>
    %183 = vector.extract_strided_slice %167 {offsets = [0, 16], sizes = [8, 16], strides = [1, 1]} : vector<8x48xf32> to vector<8x16xf32>
    %c1_85 = arith.constant 1 : index
    %c0_86 = arith.constant 0 : index
    %c0_87 = arith.constant 0 : index
    %184 = vector.load %arg10[%c1_85, %c0_86, %c0_87] : memref<2x1x16xf32, #tpu.memory_space<vmem>>, vector<1x1x16xf32>
    %185 = vector.shape_cast %184 : vector<1x1x16xf32> to vector<1x16xf32>
    %186 = arith.mulf %183, %183 : vector<8x16xf32>
    %cst_88 = arith.constant dense<0.000000e+00> : vector<8xf32>
    %187 = vector.multi_reduction <add>, %186, %cst_88 [1] : vector<8x16xf32> to vector<8xf32>
    %188 = vector.shape_cast %187 : vector<8xf32> to vector<8x1xf32>
    %cst_89 = arith.constant 1.600000e+01 : f32
    %189 = vector.broadcast %cst_89 : f32 to vector<8x1xf32>
    %190 = arith.divf %188, %189 : vector<8x1xf32>
    %191 = vector.broadcast %185 : vector<1x16xf32> to vector<8x16xf32>
    %192 = arith.mulf %191, %183 : vector<8x16xf32>
    %cst_90 = arith.constant 9.99999997E-7 : f32
    %193 = vector.broadcast %cst_90 : f32 to vector<8x1xf32>
    %194 = arith.addf %190, %193 : vector<8x1xf32>
    %195 = math.rsqrt %194 : vector<8x1xf32>
    %196 = vector.broadcast %195 : vector<8x1xf32> to vector<8x16xf32>
    %197 = arith.mulf %192, %196 : vector<8x16xf32>
    %198 = vector.extract_strided_slice %167 {offsets = [0, 32], sizes = [8, 8], strides = [1, 1]} : vector<8x48xf32> to vector<8x8xf32>
    %199 = vector.extract_strided_slice %167 {offsets = [0, 40], sizes = [8, 8], strides = [1, 1]} : vector<8x48xf32> to vector<8x8xf32>
    %c1_91 = arith.constant 1 : index
    %c0_92 = arith.constant 0 : index
    %c0_93 = arith.constant 0 : index
    %200 = vector.load %arg9[%c1_91, %c0_92, %c0_93] : memref<2x16x48xf32, #tpu.memory_space<vmem>>, vector<1x16x48xf32>
    %201 = vector.shape_cast %200 : vector<1x16x48xf32> to vector<16x48xf32>
    %cst_94 = arith.constant dense<0.000000e+00> : vector<8x48xf32>
    %202 = tpu.matmul %182, %201, %cst_94 {dimension_numbers = #tpu.dot_dimension_numbers<[1], [0], [0], [1], [0, 0, 1, 1], [], []>} : vector<8x16xf32>, vector<16x48xf32>, vector<8x48xf32> -> vector<8x48xf32>
    %203 = vector.extract_strided_slice %202 {offsets = [0, 0], sizes = [8, 16], strides = [1, 1]} : vector<8x48xf32> to vector<8x16xf32>
    %204 = vector.extract_strided_slice %202 {offsets = [0, 16], sizes = [8, 16], strides = [1, 1]} : vector<8x48xf32> to vector<8x16xf32>
    %205 = vector.extract_strided_slice %202 {offsets = [0, 32], sizes = [8, 16], strides = [1, 1]} : vector<8x48xf32> to vector<8x16xf32>
    %c1_95 = arith.constant 1 : index
    %c0_96 = arith.constant 0 : index
    %c0_97 = arith.constant 0 : index
    %206 = vector.load %arg11[%c1_95, %c0_96, %c0_97] : memref<2x16x48xf32, #tpu.memory_space<vmem>>, vector<1x16x48xf32>
    %207 = vector.shape_cast %206 : vector<1x16x48xf32> to vector<16x48xf32>
    %cst_98 = arith.constant dense<0.000000e+00> : vector<8x48xf32>
    %208 = tpu.matmul %197, %207, %cst_98 {dimension_numbers = #tpu.dot_dimension_numbers<[1], [0], [0], [1], [0, 0, 1, 1], [], []>} : vector<8x16xf32>, vector<16x48xf32>, vector<8x48xf32> -> vector<8x48xf32>
    %209 = vector.extract_strided_slice %208 {offsets = [0, 0], sizes = [8, 16], strides = [1, 1]} : vector<8x48xf32> to vector<8x16xf32>
    %210 = vector.extract_strided_slice %208 {offsets = [0, 16], sizes = [8, 32], strides = [1, 1]} : vector<8x48xf32> to vector<8x32xf32>
    %211 = arith.mulf %204, %2 : vector<8x16xf32>
    %212 = arith.mulf %205, %3 : vector<8x16xf32>
    %213 = arith.addf %211, %212 : vector<8x16xf32>
    %214 = arith.mulf %198, %4 : vector<8x8xf32>
    %215 = arith.mulf %199, %5 : vector<8x8xf32>
    %216 = arith.addf %214, %215 : vector<8x8xf32>
    %217 = vector.extract_strided_slice %203 {offsets = [0, 0], sizes = [8, 8], strides = [1, 1]} : vector<8x16xf32> to vector<8x8xf32>
    %218 = vector.extract_strided_slice %213 {offsets = [0, 0], sizes = [8, 8], strides = [1, 1]} : vector<8x16xf32> to vector<8x8xf32>
    %219 = vector.extract_strided_slice %209 {offsets = [0, 0], sizes = [8, 8], strides = [1, 1]} : vector<8x16xf32> to vector<8x8xf32>
    %220 = vector.extract_strided_slice %210 {offsets = [0, 0], sizes = [8, 16], strides = [1, 1]} : vector<8x32xf32> to vector<8x16xf32>
    %cst_99 = arith.constant dense<0.000000e+00> : vector<8x8xf32>
    %221 = tpu.matmul %217, %219, %cst_99 {dimension_numbers = #tpu.dot_dimension_numbers<[1], [1], [0], [0], [0, 0, 1, 0], [], []>} : vector<8x8xf32>, vector<8x8xf32>, vector<8x8xf32> -> vector<8x8xf32>
    %cst_100 = arith.constant dense<0.000000e+00> : vector<8x8xf32>
    %222 = tpu.matmul %218, %216, %cst_100 {dimension_numbers = #tpu.dot_dimension_numbers<[1], [1], [0], [0], [0, 0, 1, 0], [], []>} : vector<8x8xf32>, vector<8x8xf32>, vector<8x8xf32> -> vector<8x8xf32>
    %223 = arith.addf %221, %222 : vector<8x8xf32>
    %224 = arith.addf %223, %11 : vector<8x8xf32>
    %cst_101 = arith.constant dense<0xFF800000> : vector<8xf32>
    %225 = vector.multi_reduction <maximumf>, %224, %cst_101 [1] : vector<8x8xf32> to vector<8xf32>
    %226 = vector.shape_cast %225 : vector<8xf32> to vector<8x1xf32>
    %227 = vector.broadcast %226 : vector<8x1xf32> to vector<8x8xf32>
    %228 = arith.subf %224, %227 : vector<8x8xf32>
    %229 = math.exp %228 : vector<8x8xf32>
    %cst_102 = arith.constant dense<0.000000e+00> : vector<8xf32>
    %230 = vector.multi_reduction <add>, %229, %cst_102 [1] : vector<8x8xf32> to vector<8xf32>
    %231 = vector.shape_cast %230 : vector<8xf32> to vector<8x1xf32>
    %232 = tpu.reciprocal %231 {approx = true} : vector<8x1xf32> -> vector<8x1xf32>
    %233 = vector.broadcast %232 : vector<8x1xf32> to vector<8x8xf32>
    %234 = arith.mulf %229, %233 : vector<8x8xf32>
    %cst_103 = arith.constant dense<0.000000e+00> : vector<8x16xf32>
    %235 = tpu.matmul %234, %220, %cst_103 {dimension_numbers = #tpu.dot_dimension_numbers<[1], [0], [0], [1], [0, 0, 1, 1], [], []>} : vector<8x8xf32>, vector<8x16xf32>, vector<8x16xf32> -> vector<8x16xf32>
    %236 = vector.extract_strided_slice %203 {offsets = [0, 8], sizes = [8, 8], strides = [1, 1]} : vector<8x16xf32> to vector<8x8xf32>
    %237 = vector.extract_strided_slice %213 {offsets = [0, 8], sizes = [8, 8], strides = [1, 1]} : vector<8x16xf32> to vector<8x8xf32>
    %238 = vector.extract_strided_slice %209 {offsets = [0, 8], sizes = [8, 8], strides = [1, 1]} : vector<8x16xf32> to vector<8x8xf32>
    %239 = vector.extract_strided_slice %210 {offsets = [0, 16], sizes = [8, 16], strides = [1, 1]} : vector<8x32xf32> to vector<8x16xf32>
    %cst_104 = arith.constant dense<0.000000e+00> : vector<8x8xf32>
    %240 = tpu.matmul %236, %238, %cst_104 {dimension_numbers = #tpu.dot_dimension_numbers<[1], [1], [0], [0], [0, 0, 1, 0], [], []>} : vector<8x8xf32>, vector<8x8xf32>, vector<8x8xf32> -> vector<8x8xf32>
    %cst_105 = arith.constant dense<0.000000e+00> : vector<8x8xf32>
    %241 = tpu.matmul %237, %216, %cst_105 {dimension_numbers = #tpu.dot_dimension_numbers<[1], [1], [0], [0], [0, 0, 1, 0], [], []>} : vector<8x8xf32>, vector<8x8xf32>, vector<8x8xf32> -> vector<8x8xf32>
    %242 = arith.addf %240, %241 : vector<8x8xf32>
    %243 = arith.addf %242, %11 : vector<8x8xf32>
    %cst_106 = arith.constant dense<0xFF800000> : vector<8xf32>
    %244 = vector.multi_reduction <maximumf>, %243, %cst_106 [1] : vector<8x8xf32> to vector<8xf32>
    %245 = vector.shape_cast %244 : vector<8xf32> to vector<8x1xf32>
    %246 = vector.broadcast %245 : vector<8x1xf32> to vector<8x8xf32>
    %247 = arith.subf %243, %246 : vector<8x8xf32>
    %248 = math.exp %247 : vector<8x8xf32>
    %cst_107 = arith.constant dense<0.000000e+00> : vector<8xf32>
    %249 = vector.multi_reduction <add>, %248, %cst_107 [1] : vector<8x8xf32> to vector<8xf32>
    %250 = vector.shape_cast %249 : vector<8xf32> to vector<8x1xf32>
    %251 = tpu.reciprocal %250 {approx = true} : vector<8x1xf32> -> vector<8x1xf32>
    %252 = vector.broadcast %251 : vector<8x1xf32> to vector<8x8xf32>
    %253 = arith.mulf %248, %252 : vector<8x8xf32>
    %cst_108 = arith.constant dense<0.000000e+00> : vector<8x16xf32>
    %254 = tpu.matmul %253, %239, %cst_108 {dimension_numbers = #tpu.dot_dimension_numbers<[1], [0], [0], [1], [0, 0, 1, 1], [], []>} : vector<8x8xf32>, vector<8x16xf32>, vector<8x16xf32> -> vector<8x16xf32>
    %255 = tpu.concatenate %235, %254 in 1 : vector<8x16xf32>, vector<8x16xf32> -> vector<8x32xf32>
    %c1_109 = arith.constant 1 : index
    %c0_110 = arith.constant 0 : index
    %c0_111 = arith.constant 0 : index
    %256 = vector.load %arg12[%c1_109, %c0_110, %c0_111] : memref<2x32x32xf32, #tpu.memory_space<vmem>>, vector<1x32x32xf32>
    %257 = vector.shape_cast %256 : vector<1x32x32xf32> to vector<32x32xf32>
    %cst_112 = arith.constant dense<0.000000e+00> : vector<8x32xf32>
    %258 = tpu.matmul %255, %257, %cst_112 {dimension_numbers = #tpu.dot_dimension_numbers<[1], [0], [0], [1], [0, 0, 1, 1], [], []>} : vector<8x32xf32>, vector<32x32xf32>, vector<8x32xf32> -> vector<8x32xf32>
    %259 = arith.addf %150, %258 : vector<8x32xf32>
    %c1_113 = arith.constant 1 : index
    %c0_114 = arith.constant 0 : index
    %c0_115 = arith.constant 0 : index
    %260 = vector.load %arg13[%c1_113, %c0_114, %c0_115] : memref<2x1x32xf32, #tpu.memory_space<vmem>>, vector<1x1x32xf32>
    %261 = vector.shape_cast %260 : vector<1x1x32xf32> to vector<1x32xf32>
    %262 = arith.mulf %259, %259 : vector<8x32xf32>
    %cst_116 = arith.constant dense<0.000000e+00> : vector<8xf32>
    %263 = vector.multi_reduction <add>, %262, %cst_116 [1] : vector<8x32xf32> to vector<8xf32>
    %264 = vector.shape_cast %263 : vector<8xf32> to vector<8x1xf32>
    %cst_117 = arith.constant 3.200000e+01 : f32
    %265 = vector.broadcast %cst_117 : f32 to vector<8x1xf32>
    %266 = arith.divf %264, %265 : vector<8x1xf32>
    %267 = vector.broadcast %261 : vector<1x32xf32> to vector<8x32xf32>
    %268 = arith.mulf %267, %259 : vector<8x32xf32>
    %cst_118 = arith.constant 9.99999997E-7 : f32
    %269 = vector.broadcast %cst_118 : f32 to vector<8x1xf32>
    %270 = arith.addf %266, %269 : vector<8x1xf32>
    %271 = math.rsqrt %270 : vector<8x1xf32>
    %272 = vector.broadcast %271 : vector<8x1xf32> to vector<8x32xf32>
    %273 = arith.mulf %268, %272 : vector<8x32xf32>
    %c1_119 = arith.constant 1 : index
    %c0_120 = arith.constant 0 : index
    %c0_121 = arith.constant 0 : index
    %274 = vector.load %arg14[%c1_119, %c0_120, %c0_121] : memref<2x32x128xf32, #tpu.memory_space<vmem>>, vector<1x32x128xf32>
    %275 = vector.shape_cast %274 : vector<1x32x128xf32> to vector<32x128xf32>
    %cst_122 = arith.constant dense<0.000000e+00> : vector<8x128xf32>
    %276 = tpu.matmul %273, %275, %cst_122 {dimension_numbers = #tpu.dot_dimension_numbers<[1], [0], [0], [1], [0, 0, 1, 1], [], []>} : vector<8x32xf32>, vector<32x128xf32>, vector<8x128xf32> -> vector<8x128xf32>
    %277 = vector.extract_strided_slice %276 {offsets = [0, 0], sizes = [8, 64], strides = [1, 1]} : vector<8x128xf32> to vector<8x64xf32>
    %278 = arith.negf %277 : vector<8x64xf32>
    %279 = math.exp %278 : vector<8x64xf32>
    %cst_123 = arith.constant 1.000000e+00 : f32
    %280 = vector.broadcast %cst_123 : f32 to vector<8x64xf32>
    %281 = arith.addf %280, %279 : vector<8x64xf32>
    %282 = arith.divf %280, %281 : vector<8x64xf32>
    %283 = arith.mulf %277, %282 : vector<8x64xf32>
    %284 = vector.extract_strided_slice %276 {offsets = [0, 64], sizes = [8, 64], strides = [1, 1]} : vector<8x128xf32> to vector<8x64xf32>
    %285 = arith.mulf %283, %284 : vector<8x64xf32>
    %c1_124 = arith.constant 1 : index
    %c0_125 = arith.constant 0 : index
    %c0_126 = arith.constant 0 : index
    %286 = vector.load %arg15[%c1_124, %c0_125, %c0_126] : memref<2x64x32xf32, #tpu.memory_space<vmem>>, vector<1x64x32xf32>
    %287 = vector.shape_cast %286 : vector<1x64x32xf32> to vector<64x32xf32>
    %cst_127 = arith.constant dense<0.000000e+00> : vector<8x32xf32>
    %288 = tpu.matmul %285, %287, %cst_127 {dimension_numbers = #tpu.dot_dimension_numbers<[1], [0], [0], [1], [0, 0, 1, 1], [], []>} : vector<8x64xf32>, vector<64x32xf32>, vector<8x32xf32> -> vector<8x32xf32>
    %289 = arith.addf %259, %288 : vector<8x32xf32>
    %c0_128 = arith.constant 0 : index
    %c0_129 = arith.constant 0 : index
    %290 = vector.load %arg16[%c0_128, %c0_129] : memref<1x32xf32, #tpu.memory_space<vmem>>, vector<1x32xf32>
    %291 = arith.mulf %289, %289 : vector<8x32xf32>
    %cst_130 = arith.constant dense<0.000000e+00> : vector<8xf32>
    %292 = vector.multi_reduction <add>, %291, %cst_130 [1] : vector<8x32xf32> to vector<8xf32>
    %293 = vector.shape_cast %292 : vector<8xf32> to vector<8x1xf32>
    %cst_131 = arith.constant 3.200000e+01 : f32
    %294 = vector.broadcast %cst_131 : f32 to vector<8x1xf32>
    %295 = arith.divf %293, %294 : vector<8x1xf32>
    %296 = vector.broadcast %290 : vector<1x32xf32> to vector<8x32xf32>
    %297 = arith.mulf %296, %289 : vector<8x32xf32>
    %cst_132 = arith.constant 9.99999997E-7 : f32
    %298 = vector.broadcast %cst_132 : f32 to vector<8x1xf32>
    %299 = arith.addf %295, %298 : vector<8x1xf32>
    %300 = math.rsqrt %299 : vector<8x1xf32>
    %301 = vector.broadcast %300 : vector<8x1xf32> to vector<8x32xf32>
    %302 = arith.mulf %297, %301 : vector<8x32xf32>
    %c0_133 = arith.constant 0 : index
    %c0_134 = arith.constant 0 : index
    %303 = vector.load %arg17[%c0_133, %c0_134] : memref<32x256xf32, #tpu.memory_space<vmem>>, vector<32x256xf32>
    %cst_135 = arith.constant dense<0.000000e+00> : vector<8x256xf32>
    %304 = tpu.matmul %302, %303, %cst_135 {dimension_numbers = #tpu.dot_dimension_numbers<[1], [0], [0], [1], [0, 0, 1, 1], [], []>} : vector<8x32xf32>, vector<32x256xf32>, vector<8x256xf32> -> vector<8x256xf32>
    %c0_136 = arith.constant 0 : index
    %c0_137 = arith.constant 0 : index
    %c0_138 = arith.constant 0 : index
    %305 = vector.load %arg18[%c0_136, %c0_137, %c0_138] : memref<1x8x256xf32, #tpu.memory_space<vmem>>, vector<1x8x256xf32>
    %306 = vector.shape_cast %305 : vector<1x8x256xf32> to vector<8x256xf32>
    %307 = vector.shape_cast %304 : vector<8x256xf32> to vector<1x8x256xf32>
    tpu.vector_store %arg18[%c0_136, %c0_137, %c0_138], %307 {strides = array<i32>} : memref<1x8x256xf32, #tpu.memory_space<vmem>>, vector<1x8x256xf32>,
    return
  }
  func.func @transform_0(%arg0: i32) -> (i32, i32, i32) {
    %c0_i32 = arith.constant 0 : i32
    %c0_i32_0 = arith.constant 0 : i32
    %c0_i32_1 = arith.constant 0 : i32
    return %arg0, %c0_i32, %c0_i32_0 : i32, i32, i32
  }
  func.func @transform_1(%arg0: i32) -> (i32, i32) {
    %c0_i32 = arith.constant 0 : i32
    %c0_i32_0 = arith.constant 0 : i32
    %c0_i32_1 = arith.constant 0 : i32
    return %c0_i32, %c0_i32_0 : i32, i32
  }
  func.func @transform_2(%arg0: i32) -> (i32, i32) {
    %c0_i32 = arith.constant 0 : i32
    %c0_i32_0 = arith.constant 0 : i32
    %c0_i32_1 = arith.constant 0 : i32
    return %c0_i32, %c0_i32_0 : i32, i32
  }
  func.func @transform_3(%arg0: i32) -> (i32, i32) {
    %c0_i32 = arith.constant 0 : i32
    %c0_i32_0 = arith.constant 0 : i32
    %c0_i32_1 = arith.constant 0 : i32
    return %c0_i32, %c0_i32_0 : i32, i32
  }
  func.func @transform_4(%arg0: i32) -> (i32, i32) {
    %c0_i32 = arith.constant 0 : i32
    %c0_i32_0 = arith.constant 0 : i32
    %c0_i32_1 = arith.constant 0 : i32
    return %c0_i32, %c0_i32_0 : i32, i32
  }
  func.func @transform_5(%arg0: i32) -> (i32, i32, i32) {
    %c0_i32 = arith.constant 0 : i32
    %c0_i32_0 = arith.constant 0 : i32
    %c0_i32_1 = arith.constant 0 : i32
    %c0_i32_2 = arith.constant 0 : i32
    return %c0_i32, %c0_i32_0, %c0_i32_1 : i32, i32, i32
  }
  func.func @transform_6(%arg0: i32) -> (i32, i32, i32) {
    %c0_i32 = arith.constant 0 : i32
    %c0_i32_0 = arith.constant 0 : i32
    %c0_i32_1 = arith.constant 0 : i32
    %c0_i32_2 = arith.constant 0 : i32
    return %c0_i32, %c0_i32_0, %c0_i32_1 : i32, i32, i32
  }
  func.func @transform_7(%arg0: i32) -> (i32, i32, i32) {
    %c0_i32 = arith.constant 0 : i32
    %c0_i32_0 = arith.constant 0 : i32
    %c0_i32_1 = arith.constant 0 : i32
    %c0_i32_2 = arith.constant 0 : i32
    return %c0_i32, %c0_i32_0, %c0_i32_1 : i32, i32, i32
  }
  func.func @transform_8(%arg0: i32) -> (i32, i32, i32) {
    %c0_i32 = arith.constant 0 : i32
    %c0_i32_0 = arith.constant 0 : i32
    %c0_i32_1 = arith.constant 0 : i32
    %c0_i32_2 = arith.constant 0 : i32
    return %c0_i32, %c0_i32_0, %c0_i32_1 : i32, i32, i32
  }
  func.func @transform_9(%arg0: i32) -> (i32, i32, i32) {
    %c0_i32 = arith.constant 0 : i32
    %c0_i32_0 = arith.constant 0 : i32
    %c0_i32_1 = arith.constant 0 : i32
    %c0_i32_2 = arith.constant 0 : i32
    return %c0_i32, %c0_i32_0, %c0_i32_1 : i32, i32, i32
  }
  func.func @transform_10(%arg0: i32) -> (i32, i32, i32) {
    %c0_i32 = arith.constant 0 : i32
    %c0_i32_0 = arith.constant 0 : i32
    %c0_i32_1 = arith.constant 0 : i32
    %c0_i32_2 = arith.constant 0 : i32
    return %c0_i32, %c0_i32_0, %c0_i32_1 : i32, i32, i32
  }
  func.func @transform_11(%arg0: i32) -> (i32, i32, i32) {
    %c0_i32 = arith.constant 0 : i32
    %c0_i32_0 = arith.constant 0 : i32
    %c0_i32_1 = arith.constant 0 : i32
    %c0_i32_2 = arith.constant 0 : i32
    return %c0_i32, %c0_i32_0, %c0_i32_1 : i32, i32, i32
  }
  func.func @transform_12(%arg0: i32) -> (i32, i32, i32) {
    %c0_i32 = arith.constant 0 : i32
    %c0_i32_0 = arith.constant 0 : i32
    %c0_i32_1 = arith.constant 0 : i32
    %c0_i32_2 = arith.constant 0 : i32
    return %c0_i32, %c0_i32_0, %c0_i32_1 : i32, i32, i32
  }
  func.func @transform_13(%arg0: i32) -> (i32, i32, i32) {
    %c0_i32 = arith.constant 0 : i32
    %c0_i32_0 = arith.constant 0 : i32
    %c0_i32_1 = arith.constant 0 : i32
    %c0_i32_2 = arith.constant 0 : i32
    return %c0_i32, %c0_i32_0, %c0_i32_1 : i32, i32, i32
  }
  func.func @transform_14(%arg0: i32) -> (i32, i32, i32) {
    %c0_i32 = arith.constant 0 : i32
    %c0_i32_0 = arith.constant 0 : i32
    %c0_i32_1 = arith.constant 0 : i32
    %c0_i32_2 = arith.constant 0 : i32
    return %c0_i32, %c0_i32_0, %c0_i32_1 : i32, i32, i32
  }
  func.func @transform_15(%arg0: i32) -> (i32, i32) {
    %c0_i32 = arith.constant 0 : i32
    %c0_i32_0 = arith.constant 0 : i32
    %c0_i32_1 = arith.constant 0 : i32
    return %c0_i32, %c0_i32_0 : i32, i32
  }
  func.func @transform_16(%arg0: i32) -> (i32, i32) {
    %c0_i32 = arith.constant 0 : i32
    %c0_i32_0 = arith.constant 0 : i32
    %c0_i32_1 = arith.constant 0 : i32
    return %c0_i32, %c0_i32_0 : i32, i32
  }
  func.func @transform_17(%arg0: i32) -> (i32, i32, i32) {
    %c0_i32 = arith.constant 0 : i32
    %c0_i32_0 = arith.constant 0 : i32
    %c0_i32_1 = arith.constant 0 : i32
    return %arg0, %c0_i32, %c0_i32_0 : i32, i32, i32
  }
}

</mosaic_0001>

<bundles_post_ra>
// kernel: _lambda_.1
= control target key start
LH: loop header
LB: loop body
LE: loop exit
PB: predicated region body
PF: predicated region fallthrough
CT: control target
= control target key end

     0   :  { %s4086_s0 = inlined_call_operand.vmem [shape: f32[2,8,32], index: 0, kind: input, shape index: {}]   ;;  %s4087_s1 = inlined_call_operand.vmem [shape: f32[8,16], index: 1, kind: input, shape index: {}]   ;;  %s4088_s2 = inlined_call_operand.vmem [shape: f32[8,16], index: 2, kind: input, shape index: {}]   ;;  %s4089_s3 = inlined_call_operand.vmem [shape: f32[8,8], index: 3, kind: input, shape index: {}]   ;;  %s4090_s4 = inlined_call_operand.vmem [shape: f32[8,8], index: 4, kind: input, shape index: {}]   ;;  %s4091_s5 = inlined_call_operand.vmem [shape: f32[2,1,32], index: 5, kind: input, shape index: {}]   ;;  %s4092_s6 = inlined_call_operand.vmem [shape: f32[2,32,48], index: 6, kind: input, shape index: {}]   ;;  %s4093_s7 = inlined_call_operand.vmem [shape: f32[2,1,16], index: 7, kind: input, shape index: {}]   ;;  %s4094_s8 = inlined_call_operand.vmem [shape: f32[2,16,48], index: 8, kind: input, shape index: {}]   ;;  %s4095_s9 = inlined_call_operand.vmem [shape: f32[2,1,16], index: 9, kind: input, shape index: {}]   ;;  %s4096_s10 = inlined_call_operand.vmem [shape: f32[2,16,48], index: 10, kind: input, shape index: {}]   ;;  %s4097_s11 = inlined_call_operand.vmem [shape: f32[2,32,32], index: 11, kind: input, shape index: {}]   ;;  %s4098_s12 = inlined_call_operand.vmem [shape: f32[2,1,32], index: 12, kind: input, shape index: {}]   ;;  %s4099_s13 = inlined_call_operand.vmem [shape: f32[2,32,128], index: 13, kind: input, shape index: {}]   ;;  %s4100_s14 = inlined_call_operand.vmem [shape: f32[2,64,32], index: 14, kind: input, shape index: {}]   ;;  %s4101_s15 = inlined_call_operand.vmem [shape: f32[1,32], index: 15, kind: input, shape index: {}]   ;;  %s4102_s16 = inlined_call_operand.vmem [shape: f32[32,256], index: 16, kind: input, shape index: {}]   ;;  %s4103_s17 = inlined_call_operand.hbm [shape: f32[2,8,256], index: 17, kind: output, shape index: {}]  }
   0x1   :  { %4116 = sst [smem:[#allocation9_spill]] %s4086_s0 }
   0x2   :  { %4117 = sst [smem:[#allocation10_spill]] %s4087_s1 }
   0x3   :  { %4118 = sst [smem:[#allocation11_spill]] %s4088_s2 }
   0x4   :  { %22 = vsyncpa [#allocation3], 0 }
   0x5   :  { %24 = vsyncpa [#allocation3 + $0x1], 0  ;;  %s3561_s24 = smov 0   ;;  %s3563_s25 = smov 0  }
   0x6   :  { %s3565_s26 = smov 0   ;;  %s3567_s27 = smov 0  }
   0x7 LB: > { %4119 = sst [smem:[#allocation5_spill]] %s3452_s26  ;;  %s3582_s28 = sadd.s32 4294967295, %s3456_s27   ;;  %s3456_s27 = sphi %s3567_s27, %s4134_s27   ;;  %s3452_s26 = sphi %s3565_s26, %s4139_s26   ;;  %s3448_s25 = sphi %s3563_s25, %s4138_s25   ;;  %s3444_s24 = sphi %s3561_s24, %s4137_s24  }
   0x8   : > { %s2861_s29 = sadd.s32 4294967294, %s3456_s27   ;;  %s3586_s0 = sadd.s32 1, %s3456_s27  }
   0x9   : > { %4120 = sst [smem:[#allocation6_spill]] %s3586_s0  ;;  %s399_s30 = sadd.s32 1, %s3452_s26 }
   0xa   : > { %s396_s18 = ssub.s32 %s3456_s27, %s3586_s0  ;;  %p409_p0 = scmp.ne.s32.totalorder %s3452_s26, %s3448_s25 }
   0xb   : > { %p397_p1 = scmp.eq.s32.totalorder %s396_s18, 0  ;;  %p410_p2 = scmp.eq.s32.totalorder %s3582_s28, 1 }
   0xc   : > { %p415_p3 = scmp.ne.s32.totalorder %s3448_s25, %s3444_s24  ;;  %p416_p4 = scmp.eq.s32.totalorder %s2861_s29, 1 }
   0xd   : > { %s3597_s19 = scalar_select %p397_p1, %s3452_s26, %s399_s30  }
   0xe   : > { %p3599_p5 = por %p410_p2, %p409_p0  ;;  %p3603_p6 = por %p416_p4, %p415_p3 }
   0xf   : > { %4121 = sst [smem:[#allocation7_spill]] %s3597_s19  ;;  %p2864_p7 = scmp.ge.s32.totalorder %s3456_s27, 1 }
  0x10   : > { %s4123_s20 = scalar_select %p3603_p6, 1, 0 }
  0x11   : > { %p489_p8 = scmp.lt.s32.totalorder %s3456_s27, 3 }
  0x12   : > { %4124 = sst [smem:[#allocation8_spill]] %s4123_s20 }
  0x13   : > { %p490_p9 = pnand %p2864_p7, %p489_p8 }
  0x14   : > { %p540_p10 = scmp.lt.s32.totalorder (!%p490_p9), %s3582_s28, 1  ;;  %s4125_s30 = sld [smem:[#allocation9_spill]] (!%p490_p9)  ;;  %vm557_vm0 = vcmask (!%p490_p9), 261120   ;;  %v573_v3 = vld [vmem:[%s4092_s6] sm:$0xff] (!%p490_p9)  ;;  %v574_v4 = vld [vmem:[%s4092_s6 + $0x8] sm:$0xff] (!%p490_p9)  ;;  %v575_v5 = vld [vmem:[%s4092_s6 + $0x10] sm:$0xff] (!%p490_p9) }
  0x15   : > { %493 = sbr.rel (%p490_p9) target bundleno = 7012 (0x1b64), region = 88  ;;  %v3458_v6 = vmov (!%p490_p9), 0.0|0.0   ;;  %v3222_v7 = vpack.c.bf16 (!%p490_p9), %v574_v4, %v573_v3  ;;  %v576_v8 = vld [vmem:[%s4092_s6 + $0x18] sm:$0xff] (!%p490_p9)  ;;  %vm3459_vm1 = vmmov (!%p490_p9), 0   ;;  %v3460_v9 = vmov (!%p490_p9), 0.0   ;;  %s4108_s19 = smov (!%p490_p9), 112  }
  0x16   : > { %3221 = vmatprep.subr.bf16.mxu0 (!%p490_p9), %v3458_v6  ;;  %3037 = vmatprep.mubr.msk.f32.mxu0 (!%p490_p9), %vm3459_vm1, %v3460_v9  ;;  %v3225_v10 = vpack.c.bf16 (!%p490_p9), %v576_v8, %v575_v5  ;;  %v2867_v14 = vld [vmem:[%s4091_s5] ss:$0 sm:$0xff] (!%p490_p9)  ;;  %vm652_vm2 = vcmask (!%p490_p9), 130048   ;;  %v692_v24 = vld [vmem:[%s4094_s8 + $0x8] sm:$0xff] (!%p490_p9)  ;;  %s3462_s29 = smov (!%p490_p9), 40   ;;  %s4126_s2 = sld [smem:[#allocation11_spill]] (!%p490_p9)  ;;  %v549_v5 = vlaneseq (!%p490_p9) }
  0x17   : > { %3227 = vmatprep.subr.bf16.mxu1 (!%p490_p9), %v3458_v6  ;;  %3044 = vmatprep.mubr.msk.f32.mxu1 (!%p490_p9), %vm3459_vm1, %v3460_v9  ;;  %v548_v22 = vld [vmem:[%s4090_s4] sm:$0xff] (!%p490_p9)  ;;  %s3463_s20 = smov (!%p490_p9), 32   ;;  %s4127_s23 = sld [smem:[#allocation10_spill]] (!%p490_p9)  ;;  %v767_v39 = vld [vmem:[%s4096_s10 + $0x8] sm:$0xff] (!%p490_p9)  ;;  %vm877_vm3 = vcmask (!%p490_p9), 64512   ;;  %vm1552_vm5 = vcmask (!%p490_p9), 523264  }
  0x18   : > { %3223 = vmatpush3.bf16.msra.mxu0 (!%p490_p9), %v3222_v7  ;;  %v691_v23 = vld [vmem:[%s4094_s8] sm:$0xff] (!%p490_p9)  ;;  %s4113_s26 = smov (!%p490_p9), 120   ;;  %v550_v7 = vshrl.u32 (!%p490_p9), %v549_v5, 7  ;;  %v552_v8 = vand.u32 (!%p490_p9), 127, %v549_v5  ;;  %s4110_s0 = smov (!%p490_p9), 104   ;;  %v1456_v5 = vld [vmem:[%s4099_s13 + $0x8] sm:$0xff] (!%p490_p9) }
  0x19   : > { %3224 = vmatprep.subr.bf16.mxu0 (!%p490_p9), %v3458_v6  ;;  %v3228_v25 = vpack.c.bf16 (!%p490_p9), %v692_v24, %v691_v23  ;;  %v547_v27 = vld [vmem:[%s4089_s3] sm:$0xff] (!%p490_p9) }
  0x1a   : > { %v2869_v37 = vld [vmem:[%s4093_s7] ss:$0 sm:$0xff] (!%p490_p9)  ;;  %vm553_vm4 = vcmp.le.s32.totalorder (!%p490_p9), %v552_v8, %v550_v7  ;;  %v1457_v7 = vld [vmem:[%s4099_s13 + $0x10] sm:$0xff] (!%p490_p9) }
  0x1b   : > { %3229 = vmatpush3.bf16.msra.mxu1 (!%p490_p9), %v3228_v25  ;;  %v766_v38 = vld [vmem:[%s4096_s10] sm:$0xff] (!%p490_p9) }
  0x1c   : > { %s541_s21 = scalar_select %p540_p10, %s3582_s28, 1  ;;  %3226 = vmatpush3.bf16.msra.mxu0 %v3225_v10  ;;  %v546_v26 = vld [vmem:[%s4126_s2] sm:$0xff]  ;;  %3230 = vmatprep.subr.bf16.mxu1 %v3458_v6  ;;  %v3231_v42 = vpack.c.bf16 %v767_v39, %v766_v38 }
  0x1d   : > { %3064 = vmatprep.subr.mxu0 %v3460_v9  ;;  %v545_v30 = vld [vmem:[%s4127_s23] sm:$0xff] }
  0x1e   : > { %s2866_s22 = sshll.u32 %s541_s21, 3  ;;  %v2870_v47 = vld [vmem:[%s4095_s9] ss:$0 sm:$0xff] }
  0x1f   : > { %s543_s18 = scalar_lea.vmem %s4125_s30, %s2866_s22  ;;  %s4115_s22 = smov 16  }
  0x20   : > { %v3614_v0 = vld [vmem:[%s543_s18] sm:$0xff] }
  0x21   : > { %v556_v1 = vmul.f32 %v3614_v0, %v3614_v0  ;;  %v569_v15 = vmul.f32 %v2867_v14, %v3614_v0 }
  0x23   : > { %v558_v2 = vsel %vm557_vm0, %v556_v1, 0.0 }
  0x24   : > { %559 = vadd.xlane.f32.xlu0 %v558_v2 }
  0xb1   : > { %v560_v11 = vpop.xlane.xlu0 %559 }
  0xb2   : > { %v562_v12 = vmul.f32 0.03125, %v560_v11 }
  0xb4   : > { %v570_v13 = vadd.f32 1e-06, %v562_v12 }
  0xb6   : > { %3352 = vrsqrt.f32 %v570_v13  ;;  %v3467_v13 = vmov -1e+30  }
  0xb7   : > { %v3731_v14 = vsel %vm553_vm4, 0.0, %v3467_v13 }
  0xc0   : > { %v3353_v16 = vpop.eup %3352 }
  0xc1   : > { %v572_v17 = vmul.f32 %v3353_v16, %v569_v15 }
  0xc3   : > { %3038 = vmatmul.mubr.msk.f32.vlgmr.msra.gmra.mrb[0].mxu0 %vm557_vm0, %v572_v17 }
  0xc4   : > { %3066 = vmatprep.mubr.msk.f32.mxu0 %vm3459_vm1, %v3460_v9 }
 0x196   : > { %v3646_v18 = vpop.f32.mrb[0].mxu0 }
 0x197   : > { %v3039_v19 = vpop.f32.mrb[1].mxu0  ;;  %v651_v20 = vmul.f32 %v3646_v18, %v3646_v18  ;;  %v664_v40 = vmul.f32 %v2869_v37, %v3646_v18 }
 0x199   : > { %670 = vrot.lane.b32.xlu1 %v651_v20, %s4108_s19  ;;  %v653_v21 = vsel %vm652_vm2, %v651_v20, 0.0 }
 0x19a   : > { %654 = vadd.xlane.f32.xlu0 %v653_v21 }
 0x1b0   : > { %684 = vrot.lane.b32.xlu0 %v3646_v18, %s4108_s19  ;;  %s4128_s19 = smov 112  }
 0x1b4   : > { %862 = vrot.lane.b32.xlu0 %v548_v22, %s3462_s29  ;;  %s4111_s29 = smov 96  }
 0x1b8   : > { %847 = vrot.lane.b32.xlu0 %v546_v26, %s3463_s20 }
 0x1bc   : > { %857 = vrot.lane.b32.xlu0 %v547_v27, %s3463_s20  ;;  %s4129_s20 = smov 120  }
 0x1c0   : > { %842 = vrot.lane.b32.xlu0 %v545_v30, %s4115_s22 }
 0x20b   : > { %v671_v28 = vpop.permute.xlu1 %670 }
 0x20c   : > { %v673_v29 = vsel %vm652_vm2, %v671_v28, 0.0 }
 0x20d   : > { %674 = vadd.xlane.f32.xlu1 %v673_v29 }
 0x227   : > { %v655_v31 = vpop.xlane.xlu0 %654 }
 0x228   : > { %v657_v32 = vmul.f32 0.0625, %v655_v31 }
 0x22a   : > { %v665_v33 = vadd.f32 1e-06, %v657_v32 }
 0x22b   : > { %v685_v34 = vpop.permute.xlu0 %684 }
 0x22c   : > { %3354 = vrsqrt.f32 %v665_v33  ;;  %v687_v48 = vmul.f32 %v2870_v47, %v685_v34 }
 0x22f   : > { %v3675_v35 = vpop.permute.xlu0 %862 }
 0x230   : > { %v865_v36 = vmul.f32 %v3675_v35, %v3646_v18 }
 0x232   : > { %867 = vrot.lane.b32.xlu1 %v865_v36, %s4113_s26 }
 0x233   : > { %v3700_v51 = vpop.permute.xlu0 %847 }
 0x236   : > { %v3355_v41 = vpop.eup %3354 }
 0x237   : > { %v667_v43 = vmul.f32 %v3355_v41, %v664_v40  ;;  %v3702_v52 = vpop.permute.xlu0 %857 }
 0x238   : > { %v860_v57 = vmul.f32 %v3702_v52, %v3646_v18 }
 0x239   : > { %3045 = vmatmul.mubr.msk.f32.vlgmr.msra.gmra.mrb[0].mxu1 %vm652_vm2, %v667_v43 }
 0x23a   : > { %3232 = vmatpush3.bf16.msra.mxu1 %v3231_v42  ;;  %3051 = vmatprep.mubr.msk.f32.mxu1 %vm3459_vm1, %v3460_v9 }
 0x23b   : > { %3054 = vmatprep.subr.mxu1 %v3460_v9  ;;  %v3709_v59 = vpop.permute.xlu0 %842 }
 0x29a   : > { %v675_v44 = vpop.xlane.xlu1 %674 }
 0x29b   : > { %v676_v45 = vmul.f32 0.0625, %v675_v44 }
 0x29d   : > { %v688_v46 = vadd.f32 1e-06, %v676_v45 }
 0x29f   : > { %3356 = vrsqrt.f32 %v688_v46 }
 0x2a4   : > { %v868_v56 = vpop.permute.xlu1 %867 }
 0x2a5   : > { %v870_v58 = vadd.f32 %v868_v56, %v860_v57 }
 0x2a9   : > { %v3357_v49 = vpop.eup %3356 }
 0x2aa   : > { %v690_v50 = vmul.f32 %v3357_v49, %v687_v48  ;;  %v1361_v49 = vld [vmem:[%s4097_s11] sm:$0xff] }
 0x2ac   : > { %3052 = vmatmul.mubr.msk.f32.vlgmr.msra.gmra.mrb[2].mxu1 %vm652_vm2, %v690_v50  ;;  %v1362_v50 = vld [vmem:[%s4097_s11 + $0x8] sm:$0xff] }
 0x2ad   : > { %3056 = vmatprep.mubr.msk.f32.mxu1 %vm3459_vm1, %v3460_v9 }
 0x30c   : > { %v762_v53 = vpop.f32.mrb[0].mxu1 }
 0x30d   : > { %v3046_v54 = vpop.f32.mrb[1].mxu1  ;;  %v850_v55 = vmul.f32 %v3700_v51, %v762_v53  ;;  %v845_v61 = vmul.f32 %v3709_v59, %v762_v53 }
 0x30e   : > { %v3234_v54 = vpack.c.bf16 %v1362_v50, %v1361_v49  ;;  %v2893_v50 = vld [vmem:[%s4092_s6 + $0x38] sm:$0xff] }
 0x30f   : > { %852 = vrot.lane.b32.xlu0 %v850_v55, %s4128_s19  ;;  %v1364_v55 = vld [vmem:[%s4097_s11 + $0x18] sm:$0xff] }
 0x313   : > { %875 = vrot.lane.b32.xlu0 %v870_v58, %s4111_s29 }
 0x37f   : > { %v3711_v60 = vpop.f32.mrb[2].mxu1 }
 0x380   : > { %v3053_v62 = vpop.f32.mrb[3].mxu1 }
 0x381   : > { %v853_v63 = vpop.permute.xlu0 %852 }
 0x382   : > { %v855_v1 = vadd.f32 %v853_v63, %v845_v61 }
 0x384   : > { %872 = vrot.lane.b32.xlu0 %v855_v1, %s4128_s19 }
 0x385   : > { %v876_v2 = vpop.permute.xlu0 %875 }
 0x386   : > { %3055 = vmatpush3.xpose.msk.msra.mxu1 %vm877_vm3, %v876_v2 }
 0x387   : > { %3059 = vmatprep.subr.mxu1 %v3460_v9 }
 0x388   : > { %1040 = vrot.lane.b32.xlu0 %v3711_v60, %s4128_s19 }
 0x3f6   : > { %v873_v3 = vpop.permute.xlu0 %872 }
 0x3f7   : > { %3057 = vmatmul.mubr.msk.f32.vlgmr.msra.gmra.mrb[4].mxu1 %vm877_vm3, %v873_v3 }
 0x3f8   : > { %3060 = vmatpush3.xpose.msk.msra.mxu1 %vm877_vm3, %v3711_v60  ;;  %3061 = vmatprep.mubr.msk.f32.mxu1 %vm3459_vm1, %v3460_v9 }
 0x3f9   : > { %3069 = vmatprep.subr.mxu1 %v3460_v9 }
 0x3fa   : > { %v1041_v4 = vpop.permute.xlu0 %1040 }
 0x3fb   : > { %3062 = vmatmul.mubr.msk.f32.vlgmr.msra.gmra.mrb[6].mxu1 %vm877_vm3, %v762_v53  ;;  %3065 = vmatpush3.msra.mxu0 %v1041_v4  ;;  %v1455_v4 = vld [vmem:[%s4099_s13] sm:$0xff] }
 0x3fc   : > { %3070 = vmatpush3.xpose.msk.msra.mxu1 %vm877_vm3, %v876_v2  ;;  %3071 = vmatprep.mubr.msk.f32.mxu1 %vm3459_vm1, %v3460_v9  ;;  %v3240_v8 = vpack.c.bf16 %v1456_v5, %v1455_v4  ;;  %v2899_v4 = vld [vmem:[%s4094_s8 + $0x10] sm:$0xff]  ;;  %v2900_v5 = vld [vmem:[%s4094_s8 + $0x18] sm:$0xff] }
 0x3fd   : > { %3074 = vmatprep.subr.mxu0 %v3460_v9  ;;  %3079 = vmatprep.subr.mxu1 %v3460_v9 }
 0x4ca   : > { %v948_v10 = vpop.f32.mrb[4].mxu1 }
 0x4cb   : > { %v3058_v11 = vpop.f32.mrb[5].mxu1 }
 0x4ce   : > { %v1024_v12 = vpop.f32.mrb[6].mxu1 }
 0x4cf   : > { %v1025_v15 = vadd.f32 %v1024_v12, %v948_v10  ;;  %v3063_v16 = vpop.f32.mrb[7].mxu1 }
 0x4d1   : > { %v1028_v17 = vadd.f32 %v1025_v15, %v3731_v14  ;;  %v2884_v15 = vld [vmem:[%s4098_s12] ss:$0 sm:$0xff] }
 0x4d3   : > { %v1029_v18 = vsel %vm877_vm3, %v1028_v17, -inf }
 0x4d4   : > { %1030 = vmax.xlane.f32.xlu1 %v1029_v18 }
 0x4e5   : > { %1192 = vrot.lane.b32.xlu1 %v3711_v60, %s4113_s26 }
 0x4e9   : > { %1116 = vrot.lane.b32.xlu1 %v855_v1, %s4110_s0  ;;  %s4131_s0 = smov 104  }
 0x561   : > { %v1031_v19 = vpop.xlane.xlu1 %1030 }
 0x562   : > { %v1032_v20 = vsub.f32 %v1028_v17, %v1031_v19  ;;  %v1544_v19 = vld [vmem:[%s4100_s14] sm:$0xff] }
 0x564   : > { %v1033_v21 = vmul.f32 1.442695, %v1032_v20  ;;  %v1545_v20 = vld [vmem:[%s4100_s14 + $0x8] sm:$0xff] }
 0x565   : > { %v1193_v22 = vpop.permute.xlu1 %1192 }
 0x566   : > { %3358 = vpow2.f32 %v1033_v21  ;;  %v1546_v21 = vld [vmem:[%s4100_s14 + $0x10] sm:$0xff] }
 0x569   : > { %v1117_v23 = vpop.permute.xlu1 %1116 }
 0x56a   : > { %3072 = vmatmul.mubr.msk.f32.vlgmr.msra.gmra.mrb[8].mxu1 %vm877_vm3, %v1117_v23  ;;  %v1547_v23 = vld [vmem:[%s4100_s14 + $0x18] sm:$0xff] }
 0x56b   : > { %3081 = vmatprep.mubr.msk.f32.mxu1 %vm3459_vm1, %v3460_v9 }
 0x570   : > { %v3359_v24 = vpop.eup %3358 }
 0x571   : > { %v1035_v25 = vsel %vm877_vm3, %v3359_v24, 0.0 }
 0x572   : > { %1036 = vadd.xlane.f32.xlu0 %v1035_v25  ;;  %v1548_v25 = vld [vmem:[%s4100_s14 + $0x20] sm:$0xff] }
 0x588   : > { %1190 = vrot.lane.b32.xlu0 %v762_v53, %s4113_s26  ;;  %v1363_v53 = vld [vmem:[%s4097_s11 + $0x10] sm:$0xff]  ;;  %s537_s26 = sand.u32 1, %s3448_s25  }
 0x589   : > { %v3237_v56 = vpack.c.bf16 %v1364_v55, %v1363_v53  ;;  %s2788_s21 = scalar_lea.sflag [#allocation3], %s537_s26 }
 0x5ff   : > { %v1037_v26 = vpop.xlane.xlu0 %1036 }
 0x600   : > { %3360 = vrcp.f32 %v1037_v26  ;;  %v1549_v26 = vld [vmem:[%s4100_s14 + $0x28] sm:$0xff] }
 0x603   : > { %v1191_v29 = vpop.permute.xlu0 %1190 }
 0x60a   : > { %v3361_v27 = vpop.eup %3360 }
 0x60b   : > { %v1039_v28 = vmul.f32 %v3361_v27, %v3359_v24  ;;  %v3249_v24 = vpack.c.bf16 %v1547_v23, %v1546_v21  ;;  %v3252_v27 = vpack.c.bf16 %v1549_v26, %v1548_v25  ;;  %v2898_v23 = vld [vmem:[%s4095_s9 + $0x1] ss:$0 sm:$0xff] }
 0x60d   : > { %3067 = vmatmul.mubr.msk.f32.vlgmr.msra.gmra.mrb[2].mxu0 %vm877_vm3, %v1039_v28  ;;  %v1550_v28 = vld [vmem:[%s4100_s14 + $0x30] sm:$0xff] }
 0x60e   : > { %3075 = vmatpush3.xpose.msk.msra.mxu0 %vm877_vm3, %v1193_v22  ;;  %3076 = vmatprep.mubr.msk.f32.mxu0 %vm3459_vm1, %v3460_v9  ;;  %v3246_v22 = vpack.c.bf16 %v1545_v20, %v1544_v19 }
 0x60f   : > { %3233 = vmatprep.subr.bf16.mxu0 %v3458_v6 }
 0x611   : > { %3077 = vmatmul.mubr.msk.f32.vlgmr.msra.gmra.mrb[4].mxu0 %vm877_vm3, %v1191_v29  ;;  %v1551_v29 = vld [vmem:[%s4100_s14 + $0x38] sm:$0xff] }
 0x612   : > { %3092 = vmatprep.mubr.msk.f32.mxu0 %vm3459_vm1, %v3460_v9  ;;  %3235 = vmatpush3.bf16.msra.mxu0 %v3234_v54 }
 0x613   : > { %3236 = vmatprep.subr.bf16.mxu0 %v3458_v6 }
 0x616   : > { %3238 = vmatpush3.bf16.msra.mxu0 %v3237_v56 }
 0x617   : > { %3245 = vmatprep.subr.bf16.mxu0 %v3458_v6 }
 0x63d   : > { %v1186_v30 = vpop.f32.mrb[8].mxu1 }
 0x63e   : > { %v3073_v31 = vpop.f32.mrb[9].mxu1 }
 0x6e0   : > { %v1112_v32 = vpop.f32.mrb[2].mxu0 }
 0x6e1   : > { %v3068_v33 = vpop.f32.mrb[3].mxu0 }
 0x6e4   : > { %v1264_v34 = vpop.f32.mrb[4].mxu0 }
 0x6e5   : > { %v1265_v36 = vadd.f32 %v1264_v34, %v1186_v30  ;;  %v3078_v37 = vpop.f32.mrb[5].mxu0  ;;  %v3255_v30 = vpack.c.bf16 %v1551_v29, %v1550_v28 }
 0x6e7   : > { %v1268_v38 = vadd.f32 %v1265_v36, %v3731_v14 }
 0x6e9   : > { %v1269_v39 = vsel %vm877_vm3, %v1268_v38, -inf }
 0x6ea   : > { %1270 = vmax.xlane.f32.xlu1 %v1269_v39 }
 0x777   : > { %v1271_v40 = vpop.xlane.xlu1 %1270 }
 0x778   : > { %v1272_v41 = vsub.f32 %v1268_v38, %v1271_v40 }
 0x77a   : > { %v1273_v42 = vmul.f32 1.442695, %v1272_v41 }
 0x77c   : > { %3362 = vpow2.f32 %v1273_v42 }
 0x786   : > { %v3363_v43 = vpop.eup %3362 }
 0x787   : > { %v1275_v44 = vsel %vm877_vm3, %v3363_v43, 0.0 }
 0x788   : > { %1276 = vadd.xlane.f32.xlu0 %v1275_v44 }
 0x79e   : > { %1280 = vrot.lane.b32.xlu0 %v3711_v60, %s4111_s29  ;;  %s4130_s29 = smov 96  }
 0x815   : > { %v1277_v45 = vpop.xlane.xlu0 %1276 }
 0x816   : > { %3364 = vrcp.f32 %v1277_v45 }
 0x819   : > { %v1281_v46 = vpop.permute.xlu0 %1280 }
 0x81a   : > { %3080 = vmatpush3.msra.mxu1 %v1281_v46  ;;  %v2890_v46 = vld [vmem:[%s4092_s6 + $0x20] sm:$0xff] }
 0x81b   : > { %3239 = vmatprep.subr.bf16.mxu1 %v3458_v6 }
 0x820   : > { %v3365_v47 = vpop.eup %3364 }
 0x821   : > { %v1279_v48 = vmul.f32 %v3365_v47, %v3363_v43  ;;  %v2891_v47 = vld [vmem:[%s4092_s6 + $0x28] sm:$0xff] }
 0x822   : > { %v3258_v49 = vpack.c.bf16 %v2891_v47, %v2890_v46 }
 0x823   : > { %3082 = vmatmul.mubr.msk.f32.vlgmr.msra.gmra.mrb[10].mxu1 %vm877_vm3, %v1279_v48  ;;  %v2892_v48 = vld [vmem:[%s4092_s6 + $0x30] sm:$0xff] }
 0x824   : > { %3103 = vmatprep.mubr.msk.f32.mxu1 %vm3459_vm1, %v3460_v9  ;;  %3241 = vmatpush3.bf16.msra.mxu1 %v3240_v8  ;;  %v3261_v53 = vpack.c.bf16 %v2893_v50, %v2892_v48 }
 0x825   : > { %3242 = vmatprep.subr.bf16.mxu1 %v3458_v6 }
 0x8f6   : > { %v1352_v57 = vpop.f32.mrb[10].mxu1 }
 0x8f7   : > { %1357 = vrot.lane.b32.xlu1 %v1352_v57, %s4115_s22  ;;  %v3083_v58 = vpop.f32.mrb[11].mxu1  ;;  %s3469_s22 = smov 64   ;;  %v2889_v57 = vld [vmem:[%s4091_s5 + $0x1] ss:$0 sm:$0xff] }
 0x969   : > { %v1358_v60 = vpop.permute.xlu1 %1357 }
 0x96a   : > { %v1360_v61 = vsel %vm652_vm2, %v1112_v32, %v1358_v60 }
 0x96b   : > { %3093 = vmatmul.mubr.msk.f32.vlgmr.msra.gmra.mrb[6].mxu0 %vm557_vm0, %v1360_v61 }
 0x96c   : > { %3122 = vmatprep.mubr.msk.f32.mxu0 %vm3459_vm1, %v3460_v9  ;;  %3247 = vmatpush3.bf16.msra.mxu0 %v3246_v22 }
 0x96d   : > { %3248 = vmatprep.subr.bf16.mxu0 %v3458_v6 }
 0x970   : > { %3250 = vmatpush3.bf16.msra.mxu0 %v3249_v24 }
 0x971   : > { %3251 = vmatprep.subr.bf16.mxu0 %v3458_v6 }
 0x974   : > { %3253 = vmatpush3.bf16.msra.mxu0 %v3252_v27 }
 0x975   : > { %3254 = vmatprep.subr.bf16.mxu0 %v3458_v6 }
 0x978   : > { %3256 = vmatpush3.bf16.msra.mxu0 %v3255_v30 }
 0x979   : > { %3150 = vmatprep.subr.mxu0 %v3460_v9 }
 0xa3e   : > { %v1434_v62 = vpop.f32.mrb[6].mxu0 }
 0xa3f   : > { %v1438_v63 = vadd.f32 %v1434_v62, %v3614_v0  ;;  %v3094_v1 = vpop.f32.mrb[7].mxu0  ;;  %v1458_v0 = vld [vmem:[%s4099_s13 + $0x18] sm:$0xff] }
 0xa40   : > { %v3243_v10 = vpack.c.bf16 %v1458_v0, %v1457_v7  ;;  %v3264_v7 = vpack.c.bf16 %v2900_v5, %v2899_v4 }
 0xa41   : > { %v1440_v2 = vmul.f32 %v1438_v63, %v1438_v63  ;;  %v1451_v16 = vmul.f32 %v2884_v15, %v1438_v63  ;;  %v2903_v15 = vld [vmem:[%s4096_s10 + $0x18] sm:$0xff] }
 0xa42   : > { %3244 = vmatpush3.bf16.msra.mxu1 %v3243_v10 }
 0xa43   : > { %v1441_v3 = vsel %vm557_vm0, %v1440_v2, 0.0  ;;  %3257 = vmatprep.subr.bf16.mxu1 %v3458_v6 }
 0xa44   : > { %1442 = vadd.xlane.f32.xlu1 %v1441_v3 }
 0xad1   : > { %v1443_v11 = vpop.xlane.xlu1 %1442 }
 0xad2   : > { %v1444_v12 = vmul.f32 0.03125, %v1443_v11 }
 0xad4   : > { %v1452_v13 = vadd.f32 1e-06, %v1444_v12  ;;  %v2896_v12 = vld [vmem:[%s4093_s7 + $0x1] ss:$0 sm:$0xff] }
 0xad6   : > { %3366 = vrsqrt.f32 %v1452_v13  ;;  %v2902_v13 = vld [vmem:[%s4096_s10 + $0x10] sm:$0xff] }
 0xae0   : > { %v3367_v17 = vpop.eup %3366 }
 0xae1   : > { %v1454_v18 = vmul.f32 %v3367_v17, %v1451_v16 }
 0xae3   : > { %3104 = vmatmul.mubr.msk.f32.vlgmr.msra.gmra.mrb[12].mxu1 %vm557_vm0, %v1454_v18  ;;  %v3267_v18 = vpack.c.bf16 %v2903_v15, %v2902_v13 }
 0xae4   : > { %3133 = vmatprep.mubr.msk.f32.mxu1 %vm3459_vm1, %v3460_v9  ;;  %3259 = vmatpush3.bf16.msra.mxu1 %v3258_v49 }
 0xae5   : > { %3260 = vmatprep.subr.bf16.mxu1 %v3458_v6 }
 0xae8   : > { %3262 = vmatpush3.bf16.msra.mxu1 %v3261_v53 }
 0xae9   : > { %3263 = vmatprep.subr.bf16.mxu1 %v3458_v6 }
 0xbb6   : > { %v1528_v31 = vpop.f32.mrb[12].mxu1 }
 0xbb7   : > { %1540 = vrot.lane.b32.xlu0 %v1528_v31, %s3469_s22  ;;  %v3105_v32 = vpop.f32.mrb[13].mxu1  ;;  %v2886_v33 = vmul.f32 -1.442695, %v1528_v31 }
 0xbb9   : > { %3368 = vpow2.f32 %v2886_v33 }
 0xbc3   : > { %v3369_v34 = vpop.eup %3368 }
 0xbc4   : > { %v1535_v36 = vadd.f32 1.0, %v3369_v34 }
 0xbc6   : > { %3370 = vrcp.f32 %v1535_v36 }
 0xbd0   : > { %v3371_v37 = vpop.eup %3370 }
 0xbd1   : > { %v1538_v38 = vmul.f32 %v3371_v37, %v1528_v31 }
 0xc29   : > { %v1541_v39 = vpop.permute.xlu0 %1540 }
 0xc2a   : > { %v1543_v40 = vmul.f32 %v1541_v39, %v1538_v38 }
 0xc2c   : > { %3123 = vmatmul.mubr.msk.f32.vlgmr.msra.gmra.mrb[8].mxu0 %vm1552_vm5, %v1543_v40 }
 0xc2d   : > { %3152 = vmatprep.mubr.msk.f32.mxu0 %vm3459_vm1, %v3460_v9 }
 0xcff   : > { %v1622_v41 = vpop.f32.mrb[8].mxu0 }
 0xd00   : > { %v3833_v42 = vadd.f32 %v1622_v41, %v1438_v63  ;;  %v3124_v43 = vpop.f32.mrb[9].mxu0 }
 0xd02   : > { %v1629_v44 = vmul.f32 %v3833_v42, %v3833_v42  ;;  %v1640_v58 = vmul.f32 %v2889_v57, %v3833_v42 }
 0xd04   : > { %v1630_v45 = vsel %vm557_vm0, %v1629_v44, 0.0 }
 0xd05   : > { %1631 = vadd.xlane.f32.xlu0 %v1630_v45 }
 0xd92   : > { %v1632_v54 = vpop.xlane.xlu0 %1631 }
 0xd93   : > { %v1633_v55 = vmul.f32 0.03125, %v1632_v54 }
 0xd95   : > { %v1641_v56 = vadd.f32 1e-06, %v1633_v55 }
 0xd97   : > { %3372 = vrsqrt.f32 %v1641_v56 }
 0xda1   : > { %v3373_v60 = vpop.eup %3372 }
 0xda2   : > { %v1643_v61 = vmul.f32 %v3373_v60, %v1640_v58 }
 0xda4   : > { %3134 = vmatmul.mubr.msk.f32.vlgmr.msra.gmra.mrb[14].mxu1 %vm557_vm0, %v1643_v61 }
 0xda5   : > { %3140 = vmatprep.mubr.msk.f32.mxu1 %vm3459_vm1, %v3460_v9  ;;  %3265 = vmatpush3.bf16.msra.mxu1 %v3264_v7 }
 0xda6   : > { %3266 = vmatprep.subr.bf16.mxu1 %v3458_v6 }
 0xe77   : > { %v1718_v62 = vpop.f32.mrb[14].mxu1 }
 0xe78   : > { %v3135_v63 = vpop.f32.mrb[15].mxu1  ;;  %v1724_v1 = vmul.f32 %v1718_v62, %v1718_v62  ;;  %v1923_v3 = vmul.f32 %v1718_v62, %v3675_v35  ;;  %v1735_v16 = vmul.f32 %v2896_v12, %v1718_v62  ;;  %v1922_v32 = vmul.f32 %v1718_v62, %v3702_v52 }
 0xe7a   : > { %1742 = vrot.lane.b32.xlu1 %v1724_v1, %s4128_s19  ;;  %v1725_v2 = vsel %vm652_vm2, %v1724_v1, 0.0 }
 0xe7b   : > { %1726 = vadd.xlane.f32.xlu0 %v1725_v2 }
 0xe7e   : > { %1925 = vrot.lane.b32.xlu1 %v1923_v3, %s4129_s20 }
 0xeec   : > { %v1743_v8 = vpop.permute.xlu1 %1742 }
 0xeed   : > { %v1745_v0 = vsel %vm652_vm2, %v1743_v8, 0.0 }
 0xeee   : > { %1746 = vadd.xlane.f32.xlu0 %v1745_v0 }
 0xef0   : > { %v1926_v31 = vpop.permute.xlu1 %1925 }
 0xef1   : > { %v1928_v33 = vadd.f32 %v1926_v31, %v1922_v32  ;;  %v2922_v32 = vld [vmem:[%s4099_s13 + $0x20] sm:$0xff] }
 0xf04   : > { %1756 = vrot.lane.b32.xlu0 %v1718_v62, %s4128_s19 }
 0xf08   : > { %v1727_v35 = vpop.xlane.xlu0 %1726 }
 0xf09   : > { %v1728_v10 = vmul.f32 0.0625, %v1727_v35 }
 0xf0b   : > { %v1736_v11 = vadd.f32 1e-06, %v1728_v10 }
 0xf0d   : > { %3374 = vrsqrt.f32 %v1736_v11 }
 0xf17   : > { %v3375_v17 = vpop.eup %3374 }
 0xf18   : > { %v1738_v19 = vmul.f32 %v3375_v17, %v1735_v16  ;;  %v2915_v17 = vld [vmem:[%s4097_s11 + $0x20] sm:$0xff] }
 0xf1a   : > { %3141 = vmatmul.mubr.msk.f32.vlgmr.msra.gmra.mrb[16].mxu1 %vm652_vm2, %v1738_v19  ;;  %v2917_v19 = vld [vmem:[%s4097_s11 + $0x30] sm:$0xff] }
 0xf1b   : > { %3268 = vmatpush3.bf16.msra.mxu1 %v3267_v18  ;;  %3147 = vmatprep.mubr.msk.f32.mxu1 %vm3459_vm1, %v3460_v9  ;;  %v2916_v18 = vld [vmem:[%s4097_s11 + $0x28] sm:$0xff] }
 0xf1c   : > { %3155 = vmatprep.subr.mxu1 %v3460_v9 }
 0xf7b   : > { %v1747_v20 = vpop.xlane.xlu0 %1746 }
 0xf7c   : > { %v1748_v21 = vmul.f32 0.0625, %v1747_v20  ;;  %v3270_v20 = vpack.c.bf16 %v2916_v18, %v2915_v17  ;;  %v2709_v17 = vld [vmem:[%s4102_s16 + $0x30] sm:$0xff] }
 0xf7e   : > { %v1760_v22 = vadd.f32 1e-06, %v1748_v21  ;;  %v2918_v21 = vld [vmem:[%s4097_s11 + $0x38] sm:$0xff] }
 0xf7f   : > { %v1757_v24 = vpop.permute.xlu0 %1756 }
 0xf80   : > { %3376 = vrsqrt.f32 %v1760_v22  ;;  %v1759_v25 = vmul.f32 %v2898_v23, %v1757_v24  ;;  %v3273_v22 = vpack.c.bf16 %v2918_v21, %v2917_v19 }
 0xf8a   : > { %v3377_v26 = vpop.eup %3376 }
 0xf8b   : > { %v1762_v27 = vmul.f32 %v3377_v26, %v1759_v25 }
 0xf8d   : > { %3148 = vmatmul.mubr.msk.f32.vlgmr.msra.gmra.mrb[18].mxu1 %vm652_vm2, %v1762_v27 }
 0xf8e   : > { %3157 = vmatprep.mubr.msk.f32.mxu1 %vm3459_vm1, %v3460_v9 }
 0xfed   : > { %v1835_v28 = vpop.f32.mrb[16].mxu1 }
 0xfee   : > { %v3142_v29 = vpop.f32.mrb[17].mxu1  ;;  %v1916_v30 = vmul.f32 %v1835_v28, %v3700_v51  ;;  %v1915_v37 = vmul.f32 %v1835_v28, %v3709_v59 }
 0xff0   : > { %1918 = vrot.lane.b32.xlu1 %v1916_v30, %s4128_s19 }
 0xff4   : > { %1933 = vrot.lane.b32.xlu1 %v1928_v33, %s4130_s29  ;;  %v2923_v33 = vld [vmem:[%s4099_s13 + $0x28] sm:$0xff] }
0x1060   : > { %v3895_v34 = vpop.f32.mrb[18].mxu1 }
0x1061   : > { %v3149_v36 = vpop.f32.mrb[19].mxu1  ;;  %3156 = vmatpush3.xpose.msk.msra.mxu1 %vm877_vm3, %v3895_v34 }
0x1062   : > { %v1919_v38 = vpop.permute.xlu1 %1918  ;;  %3165 = vmatprep.subr.mxu1 %v3460_v9  ;;  %v2925_v36 = vld [vmem:[%s4099_s13 + $0x38] sm:$0xff] }
0x1063   : > { %v1921_v51 = vadd.f32 %v1919_v38, %v1915_v37 }
0x1064   : > { %3158 = vmatmul.mubr.msk.f32.vlgmr.msra.gmra.mrb[20].mxu1 %vm877_vm3, %v1835_v28 }
0x1065   : > { %1930 = vrot.lane.b32.xlu1 %v1921_v51, %s4128_s19  ;;  %3167 = vmatprep.mubr.msk.f32.mxu1 %vm3459_vm1, %v3460_v9 }
0x1066   : > { %v1934_v52 = vpop.permute.xlu1 %1933 }
0x1067   : > { %3151 = vmatpush3.xpose.msk.msra.mxu0 %vm877_vm3, %v1934_v52  ;;  %3166 = vmatpush3.xpose.msk.msra.mxu1 %vm877_vm3, %v1934_v52 }
0x1068   : > { %3160 = vmatprep.subr.mxu0 %v3460_v9  ;;  %3175 = vmatprep.subr.mxu1 %v3460_v9 }
0x1069   : > { %2249 = vrot.lane.b32.xlu1 %v3895_v34, %s4129_s20 }
0x10d7   : > { %v1931_v59 = vpop.permute.xlu1 %1930 }
0x10d8   : > { %3153 = vmatmul.mubr.msk.f32.vlgmr.msra.gmra.mrb[10].mxu0 %vm877_vm3, %v1931_v59  ;;  %v2921_v59 = vld [vmem:[%s4098_s12 + $0x1] ss:$0 sm:$0xff] }
0x10d9   : > { %3162 = vmatprep.mubr.msk.f32.mxu0 %vm3459_vm1, %v3460_v9 }
0x10db   : > { %v2250_v56 = vpop.permute.xlu1 %2249 }
0x1137   : > { %v2081_v39 = vpop.f32.mrb[20].mxu1 }
0x1138   : > { %v3159_v40 = vpop.f32.mrb[21].mxu1 }
0x11ab   : > { %v2005_v41 = vpop.f32.mrb[10].mxu0 }
0x11ac   : > { %v2082_v43 = vadd.f32 %v2081_v39, %v2005_v41  ;;  %v3154_v44 = vpop.f32.mrb[11].mxu0 }
0x11ad   : > { %v2929_v44 = vld [vmem:[%s4100_s14 + $0x48] sm:$0xff] }
0x11ae   : > { %v2085_v45 = vadd.f32 %v2082_v43, %v3731_v14  ;;  %v2928_v43 = vld [vmem:[%s4100_s14 + $0x40] sm:$0xff] }
0x11b0   : > { %v2086_v46 = vsel %vm877_vm3, %v2085_v45, -inf }
0x11b1   : > { %2087 = vmax.xlane.f32.xlu0 %v2086_v46  ;;  %v3282_v46 = vpack.c.bf16 %v2929_v44, %v2928_v43 }
0x11c7   : > { %2097 = vrot.lane.b32.xlu0 %v3895_v34, %s4128_s19  ;;  %s2944_s19 = sshll.u32 %s3582_s28, 8  ;;  %s3470_s28 = smov [#allocation2]  }
0x11c8   : > { %s4046_s18 = scalar_lea.hbm %s4103_s17, %s2944_s19 }
0x11cb   : > { %2173 = vrot.lane.b32.xlu0 %v1921_v51, %s4131_s0  ;;  %s4132_s0 = smov 16  }
0x123e   : > { %v2088_v47 = vpop.xlane.xlu0 %2087 }
0x123f   : > { %v2089_v48 = vsub.f32 %v2085_v45, %v2088_v47  ;;  %v2930_v45 = vld [vmem:[%s4100_s14 + $0x50] sm:$0xff]  ;;  %v2931_v47 = vld [vmem:[%s4100_s14 + $0x58] sm:$0xff] }
0x1241   : > { %v2090_v49 = vmul.f32 1.442695, %v2089_v48  ;;  %v3285_v48 = vpack.c.bf16 %v2931_v47, %v2930_v45 }
0x1242   : > { %v2098_v50 = vpop.permute.xlu0 %2097 }
0x1243   : > { %3378 = vpow2.f32 %v2090_v49  ;;  %3161 = vmatpush3.msra.mxu0 %v2098_v50  ;;  %v2933_v49 = vld [vmem:[%s4100_s14 + $0x68] sm:$0xff] }
0x1244   : > { %3170 = vmatprep.subr.mxu0 %v3460_v9 }
0x1246   : > { %v2174_v53 = vpop.permute.xlu0 %2173 }
0x1247   : > { %3168 = vmatmul.mubr.msk.f32.vlgmr.msra.gmra.mrb[22].mxu1 %vm877_vm3, %v2174_v53  ;;  %v2934_v53 = vld [vmem:[%s4100_s14 + $0x70] sm:$0xff] }
0x1248   : > { %3177 = vmatprep.mubr.msk.f32.mxu1 %vm3459_vm1, %v3460_v9 }
0x124d   : > { %v3379_v54 = vpop.eup %3378 }
0x124e   : > { %v2092_v55 = vsel %vm877_vm3, %v3379_v54, 0.0 }
0x124f   : > { %2093 = vadd.xlane.f32.xlu1 %v2092_v55 }
0x1260   : > { %2247 = vrot.lane.b32.xlu1 %v1835_v28, %s4129_s20 }
0x12dc   : > { %v2094_v57 = vpop.xlane.xlu1 %2093 }
0x12dd   : > { %3380 = vrcp.f32 %v2094_v57 }
0x12e0   : > { %v2248_v61 = vpop.permute.xlu1 %2247 }
0x12e7   : > { %v3381_v58 = vpop.eup %3380 }
0x12e8   : > { %v2096_v60 = vmul.f32 %v3381_v58, %v3379_v54  ;;  %v2935_v54 = vld [vmem:[%s4100_s14 + $0x78] sm:$0xff] }
0x12e9   : > { %v3291_v55 = vpack.c.bf16 %v2935_v54, %v2934_v53 }
0x12ea   : > { %3163 = vmatmul.mubr.msk.f32.vlgmr.msra.gmra.mrb[12].mxu0 %vm877_vm3, %v2096_v60 }
0x12eb   : > { %3171 = vmatpush3.xpose.msk.msra.mxu0 %vm877_vm3, %v2250_v56  ;;  %3172 = vmatprep.mubr.msk.f32.mxu0 %vm3459_vm1, %v3460_v9 }
0x12ec   : > { %3269 = vmatprep.subr.bf16.mxu0 %v3458_v6 }
0x12ee   : > { %3173 = vmatmul.mubr.msk.f32.vlgmr.msra.gmra.mrb[14].mxu0 %vm877_vm3, %v2248_v61 }
0x12ef   : > { %3188 = vmatprep.mubr.msk.f32.mxu0 %vm3459_vm1, %v3460_v9  ;;  %3271 = vmatpush3.bf16.msra.mxu0 %v3270_v20 }
0x12f0   : > { %3272 = vmatprep.subr.bf16.mxu0 %v3458_v6 }
0x12f3   : > { %3274 = vmatpush3.bf16.msra.mxu0 %v3273_v22  ;;  %v2937_v22 = vld [vmem:[%s4101_s15] ss:$0 sm:$0xff] }
0x12f4   : > { %3281 = vmatprep.subr.bf16.mxu0 %v3458_v6 }
0x131a   : > { %v2243_v62 = vpop.f32.mrb[22].mxu1 }
0x131b   : > { %v3169_v63 = vpop.f32.mrb[23].mxu1 }
0x13bd   : > { %v2169_v1 = vpop.f32.mrb[12].mxu0 }
0x13be   : > { %v3164_v2 = vpop.f32.mrb[13].mxu0 }
0x13c1   : > { %v2321_v3 = vpop.f32.mrb[14].mxu0 }
0x13c2   : > { %v2322_v4 = vadd.f32 %v2321_v3, %v2243_v62  ;;  %v3174_v5 = vpop.f32.mrb[15].mxu0 }
0x13c4   : > { %v2325_v7 = vadd.f32 %v2322_v4, %v3731_v14 }
0x13c6   : > { %v2326_v8 = vsel %vm877_vm3, %v2325_v7, -inf }
0x13c7   : > { %2327 = vmax.xlane.f32.xlu0 %v2326_v8  ;;  %v2704_v8 = vld [vmem:[%s4102_s16 + $0x8] sm:$0xff] }
0x13dd   : > { %2337 = vrot.lane.b32.xlu0 %v3895_v34, %s4130_s29  ;;  %v3276_v34 = vpack.c.bf16 %v2923_v33, %v2922_v32  ;;  %s2865_s29 = sshll.u32 %s537_s26, 4 }
0x1454   : > { %v2328_v0 = vpop.xlane.xlu0 %2327 }
0x1455   : > { %v2329_v35 = vsub.f32 %v2325_v7, %v2328_v0  ;;  %v2706_v0 = vld [vmem:[%s4102_s16 + $0x18] sm:$0xff] }
0x1457   : > { %v2330_v10 = vmul.f32 1.442695, %v2329_v35  ;;  %v3293_v35 = vpack.c.bf16 %v2706_v0, %v2704_v8 }
0x1458   : > { %v2338_v11 = vpop.permute.xlu0 %2337 }
0x1459   : > { %3382 = vpow2.f32 %v2330_v10  ;;  %3176 = vmatpush3.msra.mxu1 %v2338_v11  ;;  %v2703_v10 = vld [vmem:[%s4102_s16] sm:$0xff]  ;;  %v2705_v11 = vld [vmem:[%s4102_s16 + $0x10] sm:$0xff] }
0x145a   : > { %3275 = vmatprep.subr.bf16.mxu1 %v3458_v6 }
0x1463   : > { %v3383_v12 = vpop.eup %3382 }
0x1464   : > { %v2332_v13 = vsel %vm877_vm3, %v3383_v12, 0.0 }
0x1465   : > { %2333 = vadd.xlane.f32.xlu1 %v2332_v13  ;;  %v2708_v13 = vld [vmem:[%s4102_s16 + $0x28] sm:$0xff] }
0x14f2   : > { %v2334_v15 = vpop.xlane.xlu1 %2333 }
0x14f3   : > { %3384 = vrcp.f32 %v2334_v15  ;;  %v2710_v15 = vld [vmem:[%s4102_s16 + $0x38] sm:$0xff] }
0x14fd   : > { %v3385_v14 = vpop.eup %3384 }
0x14fe   : > { %v2336_v16 = vmul.f32 %v3385_v14, %v3383_v12  ;;  %v3295_v12 = vpack.c.bf16 %v2705_v11, %v2703_v10  ;;  %v3297_v14 = vpack.c.bf16 %v2710_v15, %v2708_v13 }
0x1500   : > { %3178 = vmatmul.mubr.msk.f32.vlgmr.msra.gmra.mrb[24].mxu1 %vm877_vm3, %v2336_v16  ;;  %v2707_v16 = vld [vmem:[%s4102_s16 + $0x20] sm:$0xff] }
0x1501   : > { %3199 = vmatprep.mubr.msk.f32.mxu1 %vm3459_vm1, %v3460_v9  ;;  %3277 = vmatpush3.bf16.msra.mxu1 %v3276_v34  ;;  %v3299_v18 = vpack.c.bf16 %v2709_v17, %v2707_v16 }
0x1502   : > { %3278 = vmatprep.subr.bf16.mxu1 %v3458_v6 }
0x15d3   : > { %v2409_v23 = vpop.f32.mrb[24].mxu1 }
0x15d4   : > { %2414 = vrot.lane.b32.xlu1 %v2409_v23, %s4132_s0  ;;  %v3179_v24 = vpop.f32.mrb[25].mxu1 }
0x1646   : > { %v2415_v25 = vpop.permute.xlu1 %2414 }
0x1647   : > { %v2417_v26 = vsel %vm652_vm2, %v2169_v1, %v2415_v25 }
0x1648   : > { %3189 = vmatmul.mubr.msk.f32.vlgmr.msra.gmra.mrb[16].mxu0 %vm557_vm0, %v2417_v26 }
0x1649   : > { %3218 = vmatprep.mubr.msk.f32.mxu0 %vm3459_vm1, %v3460_v9  ;;  %3283 = vmatpush3.bf16.msra.mxu0 %v3282_v46 }
0x164a   : > { %3284 = vmatprep.subr.bf16.mxu0 %v3458_v6 }
0x164d   : > { %3286 = vmatpush3.bf16.msra.mxu0 %v3285_v48 }
0x164e   : > { %3287 = vmatprep.subr.bf16.mxu0 %v3458_v6 }
0x171b   : > { %v2492_v27 = vpop.f32.mrb[16].mxu0 }
0x171c   : > { %v2496_v28 = vadd.f32 %v2492_v27, %v3833_v42  ;;  %v3190_v29 = vpop.f32.mrb[17].mxu0  ;;  %v2924_v42 = vld [vmem:[%s4099_s13 + $0x30] sm:$0xff] }
0x171d   : > { %v3279_v37 = vpack.c.bf16 %v2925_v36, %v2924_v42 }
0x171e   : > { %v2499_v30 = vmul.f32 %v2496_v28, %v2496_v28  ;;  %v2510_v39 = vmul.f32 %v2921_v59, %v2496_v28 }
0x171f   : > { %3280 = vmatpush3.bf16.msra.mxu1 %v3279_v37 }
0x1720   : > { %v2500_v31 = vsel %vm557_vm0, %v2499_v30, 0.0  ;;  %3294 = vmatprep.subr.bf16.mxu1 %v3293_v35 }
0x1721   : > { %2501 = vadd.xlane.f32.xlu0 %v2500_v31 }
0x17ae   : > { %v2502_v38 = vpop.xlane.xlu0 %2501 }
0x17af   : > { %v2503_v51 = vmul.f32 0.03125, %v2502_v38 }
0x17b1   : > { %v2511_v52 = vadd.f32 1e-06, %v2503_v51 }
0x17b3   : > { %3386 = vrsqrt.f32 %v2511_v52 }
0x17bd   : > { %v3387_v40 = vpop.eup %3386 }
0x17be   : > { %v2513_v41 = vmul.f32 %v3387_v40, %v2510_v39 }
0x17c0   : > { %3200 = vmatmul.mubr.msk.f32.vlgmr.msra.gmra.mrb[26].mxu1 %vm557_vm0, %v2513_v41 }
0x17c1   : > { %2778 = vmatprep.mubr.f32.mxu1 %v3460_v9  ;;  %v2932_v9 = vld [vmem:[%s4100_s14 + $0x60] sm:$0xff]  ;;  %3296 = vmatpush1.bf16.msra.mxu1 %v3295_v12 }
0x17c2   : > { %v3288_v50 = vpack.c.bf16 %v2933_v49, %v2932_v9  ;;  %3298 = vmatprep.subr.bf16.mxu1 %v3297_v14 }
0x17c4   : > { %3289 = vmatpush3.bf16.msra.mxu0 %v3288_v50 }
0x17c5   : > { %3290 = vmatprep.subr.bf16.mxu0 %v3458_v6  ;;  %3300 = vmatpush1.bf16.msra.mxu1 %v3299_v18 }
0x17c8   : > { %3292 = vmatpush3.bf16.msra.mxu0 %v3291_v55 }
0x1893   : > { %v2588_v56 = vpop.f32.mrb[26].mxu1 }
0x1894   : > { %2600 = vrot.lane.b32.xlu1 %v2588_v56, %s3469_s22  ;;  %v3201_v57 = vpop.f32.mrb[27].mxu1  ;;  %v2927_v58 = vmul.f32 -1.442695, %v2588_v56  ;;  %s539_s22 = scalar_lea.vmem [#allocation2], %s2865_s29  ;;  %s3398_s29 = sshll.u32 %s3470_s28, 4  ;;  %s3399_s29 = int_to_ptr.vmem [resolvable:$false] %s3398_s29 }
0x1895   : > { %s2802_s0 = sshll.u32 %s539_s22, 4  ;;  %s3400_s2 = scalar_lea.vmem %s3399_s29, 512  ;;  %s4041_s0 = int_to_ptr.vmem [resolvable:$true] %s2802_s0 }
0x1896   : > { %3388 = vpow2.f32 %v2927_v58  ;;  %s3394_s23 = scalar_lea.vmem %s4041_s0, 256  ;;  %p3401_p0 = scmp.lt.s32.totalorder %s4041_s0, %s3399_s29 }
0x1897   : > { %p3395_p11 = scmp.ne.s32.totalorder %s4041_s0, %s3394_s23  ;;  %p3402_p1 = scmp.lt.s32.totalorder %s3400_s2, %s3394_s23 }
0x1899   : > { %p3396_p12 = pnand %p3395_p11, %p3599_p5  ;;  %p3403_p2 = por %p3402_p1, %p3401_p0 }
0x189b   : > { %p3397_p13 = pneg %p3396_p12 }
0x189d   : > { %p3404_p3 = pnand %p3403_p2, %p3397_p13 }
0x18a0   : > { %v3389_v60 = vpop.eup %3388 }
0x18a1   : > { %v2595_v61 = vadd.f32 1.0, %v3389_v60 }
0x18a3   : > { %3390 = vrcp.f32 %v2595_v61 }
0x18ad   : > { %v3391_v62 = vpop.eup %3390 }
0x18ae   : > { %v2598_v63 = vmul.f32 %v3391_v62, %v2588_v56 }
0x1906   : > { %v2601_v1 = vpop.permute.xlu1 %2600 }
0x1907   : > { %v2603_v2 = vmul.f32 %v2601_v1, %v2598_v63 }
0x1909   : > { %3219 = vmatmul.mubr.msk.f32.vlgmr.msra.gmra.mrb[18].mxu0 %vm1552_vm5, %v2603_v2 }
0x19dc   : > { %v2682_v3 = vpop.f32.mrb[18].mxu0 }
0x19dd   : > { %v2686_v4 = vadd.f32 %v2682_v3, %v2496_v28  ;;  %v3220_v5 = vpop.f32.mrb[19].mxu0 }
0x19df   : > { %v2688_v6 = vmul.f32 %v2686_v4, %v2686_v4  ;;  %v2699_v23 = vmul.f32 %v2937_v22, %v2686_v4 }
0x19e1   : > { %v2689_v7 = vsel %vm557_vm0, %v2688_v6, 0.0 }
0x19e2   : > { %2690 = vadd.xlane.f32.xlu1 %v2689_v7 }
0x1a6f   : > { %v2691_v19 = vpop.xlane.xlu1 %2690 }
0x1a70   : > { %v2692_v20 = vmul.f32 0.03125, %v2691_v19 }
0x1a72   : > { %v2700_v21 = vadd.f32 1e-06, %v2692_v20 }
0x1a74   : > { %3392 = vrsqrt.f32 %v2700_v21 }
0x1a7e   : > { %v3393_v24 = vpop.eup %3392 }
0x1a7f   : > { %v2702_v25 = vmul.f32 %v3393_v24, %v2699_v23 }
0x1a81   : > { %2938 = vmatmul.mubr.msk.f32.vlgmr.msra.gmra.mrb[28].mxu1 %vm557_vm0, %v2702_v25 }
0x1b54   : > { %v2780_v26 = vpop.f32.mrb[28].mxu1 }
0x1b55   : > { %2785 = vst [vmem:[%s539_s22] sm:$0xff] %v2780_v26  ;;  %v2782_v27 = vpop.f32.mrb[29].mxu1 }
0x1b56   : > { %2786 = vst [vmem:[%s539_s22 + $0x8] sm:$0xff] %v2782_v27 }
0x1b57   : > { %3407 = shalt.err (!%p3404_p3)
}
0x1b58   : > { %s3408_s26 = scalar_lea.hbm %s4046_s18, 256  ;;  %s3412_s20 = scalar_lea.hbm %s4103_s17, 512 }
0x1b59   : > { %p3409_p4 = scmp.ne.s32.totalorder %s4046_s18, %s3408_s26  ;;  %p3413_p9 = scmp.lt.u32.totalorder %s4046_s18, %s4103_s17 }
0x1b5a   : > { %p3414_p10 = scmp.lt.u32.totalorder %s3412_s20, %s3408_s26  ;;  %p3416_p12 = scmp.lt.u32.totalorder %s3408_s26, %s4046_s18 }
0x1b5b   : > { %p3410_p7 = pnand %p3409_p4, %p3599_p5 }
0x1b5c   : > { %p3415_p11 = por %p3414_p10, %p3413_p9 }
0x1b5d   : > { %p3411_p8 = pneg %p3410_p7 }
0x1b5e   : > { %p3417_p13 = por %p3416_p12, %p3415_p11 }
0x1b60   : > { %p3418_p0 = pnand %p3417_p13, %p3411_p8 }
0x1b62   : > { %3421 = shalt.err (!%p3418_p0)
}
0x1b63   : > { %3301 = dma.vmem_to_hbm [thread:$0]  (%p3599_p5), %s4041_s0, 256, %s4046_s18, %s2788_s21  }
0x1b64 PF: > { %p3307_p1 = scmp.ge.s32.totalorder %s3456_s27, 2  ;;  %s2814_s23 = sand.u32 1, %s3444_s24  }
0x1b65   : > { %s2815_s29 = scalar_lea.sflag [#allocation3], %s2814_s23 }
0x1b66   : > { %p3304_p2 = pnand %p3307_p1, %p3603_p6 }
0x1b68   : > { %3439 = dma.done.wait (!%p3304_p2), %s2815_s29, 256  }
0x1b69   : > { %3441 = vsyncadd (!%p3304_p2), %s2815_s29, 4294967040  ;;  %s4134_s27 = sld [smem:[#allocation6_spill]]  ;;  %s4135_s26 = sld [smem:[#allocation5_spill]] }
0x1b6a   : > { %s4136_s22 = sld [smem:[#allocation7_spill]]  ;;  %s4137_s24 = smov %s3448_s25 }
0x1b6f   : > { %p27_p3 = scmp.ge.s32.totalorder %s4134_s27, 4   ;;  %s4138_s25 = smov %s4135_s26 }
0x1b70   : > { %s4139_s26 = smov %s4136_s22 }
0x1b71   :  { %29 = sbr.rel (!%p27_p3) target bundleno = 7 (0x7), region = 133 }
0x1b78   :  { %2820 = vsyncpa [#allocation3], 1 }
0x1b79   :  { %2822 = vsyncpa [#allocation3 + $0x1], 1 }

</bundles_post_ra>
